<compile_context>
chip_gen: v7x
topology: tpu7x:2x2x1
jax: 0.10.0
libtpu: 0.0.40
codegen_flags: <defaults>
</compile_context>

<pallas_src>
import jax
import jax.numpy as jnp
from jax.experimental import pallas as pl
from jax.experimental.pallas import tpu as pltpu


def _round_up(x, m):
    return (x + m - 1) // m * m


def _cdiv(a, b):
    return (a + b - 1) // b


# ----------------------------- JAX glue (grouping) ---------------------------
# TODO(synk): ball_query + neighbor gather is data-dependent indexing; kept as XLA
# glue (a Pallas DMA-gather would need scalar-prefetched index tables).

def ball_query(radius, nsample, xyz, new_xyz):
    """pointnet2 ball_query: up to `nsample` indices with dist<radius, ascending
    point-index order, padded with the first found index."""
    d2 = jnp.sum((new_xyz[:, :, None, :] - xyz[:, None, :, :]) ** 2, axis=-1)  # (B,M,N)
    N = xyz.shape[1]
    within = d2 < radius * radius
    key = jnp.where(within, jnp.arange(N)[None, None, :], N)
    sorted_idx = jnp.sort(key, axis=-1)[..., :nsample]
    first = sorted_idx[..., :1]
    idx = jnp.where(sorted_idx >= N, first, sorted_idx)
    idx = jnp.minimum(idx, N - 1)
    return idx.astype(jnp.int32)


def group_features(x, idx):
    # x: (B, N, d), idx: (B, M, K) -> (B, M, K, d)
    return jax.vmap(lambda xb, ib: xb[ib])(x, idx)


# ------------------------------- Pallas kernel --------------------------------

def make_dense_edge_conv_kernel(num_layers, knn, d, growth, g_lane, tm, block_meta,
                                compute_dtype, seg_dtype):
    """block_meta: tuple of (row_offset, rows) into the packed weight array, in
    consumption order: [Wn1] + [layer-l segment weights s=0..l-1, for l=1..L-1]."""

    def kernel(knn_ref, x_ref, wpack_ref, wx_ref, bias_ref, out_ref):
        kn3 = knn_ref[...]                       # (tm, K, d) compute_dtype — one contiguous DMA
        kn = kn3.reshape(tm * knn, d)            # leading-dim merge: layout-preserving
        xv = x_ref[...]                          # (tm, d) f32 — pass-through channels stay exact
        wp = wpack_ref[...]                      # (R, g)  compute_dtype — VMEM resident

        # Hoisted x-path: every layer's (x @ Wx_l + b_l) in ONE wide matmul; stripes are
        # 128-lane aligned so per-layer slices stay lane-aligned.
        x_all = jnp.dot(xv.astype(compute_dtype), wx_ref[...],
                        preferred_element_type=jnp.float32) + bias_ref[...]  # (tm, L*g_lane) f32

        def x_stripe(l):
            return x_all[:, l * g_lane:l * g_lane + growth]                  # (tm, g) f32

        widx = [0]

        def next_w():
            off, rows = block_meta[widx[0]]
            widx[0] += 1
            return wp[off:off + rows, :]         # static, 8-row-aligned offsets

        # ---- layer 1: [x, knn, knn-x] concat folded into weights; K batched into M ----
        acc = jnp.dot(kn, next_w(), preferred_element_type=jnp.float32)      # (tm*K, g) f32
        h3 = jnp.maximum(acc.reshape(tm, knn, growth) + x_stripe(0)[:, None, :], 0.0)
        segs = [h3.astype(seg_dtype).reshape(tm * knn, growth)]              # newest first

        # ---- dense chain: segment-wise partial dots (no activation concats) ----
        for l in range(1, num_layers):
            acc = jnp.dot(segs[0], next_w(), preferred_element_type=jnp.float32)
            for s in range(1, l):
                acc = acc + jnp.dot(segs[s], next_w(), preferred_element_type=jnp.float32)
            z3 = acc.reshape(tm, knn, growth) + x_stripe(l)[:, None, :]
            if l < num_layers - 1:
                z3 = jnp.maximum(z3, 0.0)        # last FCLayer is Identity (no ReLU)
            segs.insert(0, z3.astype(seg_dtype).reshape(tm * knn, growth))

        # ---- aggr='max' over the K neighbors: axis reduction on the (tm, K, g) view ----
        finals = [jnp.max(s.reshape(tm, knn, growth), axis=1).astype(jnp.float32)
                  for s in segs]
        finals.append(xv)                        # x channels are K-invariant (exact f32)
        out_ref[...] = jnp.concatenate(finals, axis=-1)   # (tm, out_ch) true-width store

    return kernel


def _detect_vmem_capacity_bytes():
    try:
        return int(pltpu.get_tpu_info().vmem_capacity_bytes)
    except Exception:
        return None


def dense_edge_conv_forward(x, pos, params, *, knn, radius, tm=None,
                            compute_dtype=jnp.bfloat16, seg_dtype=None):
    """x: (B, N, d), pos: (B, N, 3); params = [(W, b)] for [layer_first, middle..., last].
    Returns (B, N, d + L*growth).  compute_dtype=bf16 halves the dominant HBM stream on
    every TPU generation (accumulation is always f32); seg_dtype controls the stored
    dense-chain segments (default = compute_dtype; use f32 on v5e if desired)."""
    B, N, d = x.shape
    L = len(params)
    growth = params[0][0].shape[1]
    out_ch = d + L * growth
    g_lane = _round_up(growth, 128)
    f32 = jnp.float32
    if seg_dtype is None:
        seg_dtype = compute_dtype

    # ---- generation-aware tiling / VMEM budget ----
    vmem_cap = _detect_vmem_capacity_bytes()
    if vmem_cap is not None and vmem_cap <= 64 * 1024 * 1024:      # v7x-class: 64 MiB / TC
        tm_default, vmem_limit = 512, 48 * 1024 * 1024
    elif vmem_cap is not None:                                     # v5e / v6e: 128 MiB
        tm_default, vmem_limit = 1024, 96 * 1024 * 1024
    else:                                                          # unknown: conservative
        tm_default, vmem_limit = 512, None
    tm_req = tm if tm is not None else tm_default

    # ---- neighbor gather (QueryAndGroup equivalent), gathered directly in bf16 ----
    idx = ball_query(radius, knn, pos, pos)                        # (B, N, K)
    knn_feat = group_features(x.astype(compute_dtype), idx)        # (B, N, K, d)

    BN = B * N
    tm_eff = min(_round_up(tm_req, 8), _round_up(BN, 8))
    nblk = _cdiv(BN, tm_eff)
    if nblk > 1 and nblk % 2 == 1:
        nblk += 1                                # even shards -> balanced v7x megacore split
    BN_pad = nblk * tm_eff

    knn_rows = knn_feat.reshape(BN, knn, d)      # leading-dim flatten only: no HBM relayout
    x_rows = x.reshape(BN, d).astype(f32)
    if BN_pad != BN:
        knn_rows = jnp.pad(knn_rows, ((0, BN_pad - BN), (0, 0), (0, 0)))
        x_rows = jnp.pad(x_rows, ((0, BN_pad - BN), (0, 0)))

    # ---- weight packing ----
    # Fold the [x, knn, knn-x] edge concat into layer-1 weights:
    #   edge@W1 = x@(Wa-Wc) + knn@(Wb+Wc).
    W1, b1 = params[0]
    W1 = W1.astype(f32)
    Wa, Wb, Wc = W1[:d], W1[d:2 * d], W1[2 * d:3 * d]

    # Hoisted x-path weights/biases: one stripe of width g_lane (128-aligned) per layer.
    wx_all = jnp.zeros((d, L * g_lane), f32).at[:, 0:growth].set(Wa - Wc)
    bias_all = jnp.zeros((1, L * g_lane), f32).at[:, 0:growth].set(
        b1.reshape(1, -1).astype(f32))

    # Packed neighbor/segment-path weights (one resident VMEM array, 8-row-aligned blocks).
    pack_blocks, block_meta = [], []
    off = 0

    def _append(Wblk):
        nonlocal off
        pack_blocks.append(Wblk)
        block_meta.append((off, Wblk.shape[0]))
        off += _round_up(Wblk.shape[0], 8)

    _append(Wb + Wc)                             # folded layer-1 neighbor-path weight (d, g)
    for li, (W, b) in enumerate(params[1:], start=1):
        W = W.astype(f32)
        for s in range(li):                      # h-segment weights, newest-segment first
            _append(W[s * growth:(s + 1) * growth])
        wx_all = wx_all.at[:, li * g_lane:li * g_lane + growth].set(
            W[li * growth:li * growth + d])
        bias_all = bias_all.at[:, li * g_lane:li * g_lane + growth].set(
            b.reshape(1, -1).astype(f32))

    w_pack = jnp.zeros((off, growth), f32)
    for Wblk, (o, r) in zip(pack_blocks, block_meta):
        w_pack = w_pack.at[o:o + r, :].set(Wblk)
    w_pack = w_pack.astype(compute_dtype)
    wx_all = wx_all.astype(compute_dtype)        # bias_all stays f32 (added to f32 accumulator)

    kernel = make_dense_edge_conv_kernel(L, knn, d, growth, g_lane, tm_eff,
                                         tuple(block_meta), compute_dtype, seg_dtype)

    # ---- BlockSpecs ----
    use_deep_buffer = (vmem_cap is not None and vmem_cap >= 100 * 1024 * 1024
                       and nblk >= 4)            # only worthwhile on 128-MiB parts, long grids
    knn_block = (tm_eff, knn, d)
    knn_idx = lambda i: (i, 0, 0)
    if use_deep_buffer:
        try:
            knn_spec = pl.BlockSpec(knn_block, knn_idx, pipeline_mode=pl.Buffered(3))
        except Exception:
            knn_spec = pl.BlockSpec(knn_block, knn_idx)
    else:
        knn_spec = pl.BlockSpec(knn_block, knn_idx)

    in_specs = [
        knn_spec,                                             # dominant stream, bf16
        pl.BlockSpec((tm_eff, d), lambda i: (i, 0)),          # center features, f32
        pl.BlockSpec(w_pack.shape, lambda i: (0, 0)),         # packed segment weights (resident)
        pl.BlockSpec(wx_all.shape, lambda i: (0, 0)),         # hoisted x-path weights (resident)
        pl.BlockSpec(bias_all.shape, lambda i: (0, 0)),       # hoisted biases (resident)
    ]
    out_spec = pl.BlockSpec((tm_eff, out_ch), lambda i: (i, 0))  # true-width store, no lane pad

    # Advisory cost estimate so XLA schedules the gather glue around the call.
    row_flops = 2 * growth * d
    for l in range(2, L + 1):
        row_flops += 2 * growth * growth * (l - 1)
    point_flops = 2 * d * L * g_lane
    bytes_accessed = int(knn_rows.size * knn_rows.dtype.itemsize
                         + x_rows.size * 4
                         + BN_pad * out_ch * 4
                         + w_pack.size * w_pack.dtype.itemsize
                         + wx_all.size * wx_all.dtype.itemsize
                         + bias_all.size * 4)
    cost = pl.CostEstimate(flops=int(BN_pad * knn * row_flops + BN_pad * point_flops),
                           transcendentals=0, bytes_accessed=bytes_accessed)

    cp_kwargs = dict(dimension_semantics=("parallel",))
    if vmem_limit is not None:
        cp_kwargs["vmem_limit_bytes"] = int(vmem_limit)

    out = pl.pallas_call(
        kernel,
        out_shape=jax.ShapeDtypeStruct((BN_pad, out_ch), f32),
        grid_spec=pltpu.PrefetchScalarGridSpec(
            num_scalar_prefetch=0,
            grid=(nblk,),
            in_specs=in_specs,
            out_specs=out_spec,
        ),
        compiler_params=pltpu.CompilerParams(**cp_kwargs),
        cost_estimate=cost,
    )(knn_rows, x_rows, w_pack, wx_all, bias_all)

    return out[:BN].reshape(B, N, out_ch)


# --------------------------- pure-JAX reference -------------------------------

def reference_forward(x, pos, params, *, knn, radius):
    idx = ball_query(radius, knn, pos, pos)
    knn_feat = group_features(x, idx)
    x_tiled = jnp.broadcast_to(x[:, :, None, :], knn_feat.shape)
    edge = jnp.concatenate([x_tiled, knn_feat, knn_feat - x_tiled], axis=-1)

    wf, bf = params[0]
    y = jnp.concatenate([jax.nn.relu(edge @ wf + bf), x_tiled], axis=-1)
    for w, b in params[1:-1]:
        y = jnp.concatenate([jax.nn.relu(y @ w + b), y], axis=-1)
    wl, bl = params[-1]
    y = jnp.concatenate([y @ wl + bl, y], axis=-1)
    return jnp.max(y, axis=-2)


# ------------------------------------ main ------------------------------------

if __name__ == "__main__":
    key = jax.random.PRNGKey(0)
    B, N, d = 2, 16, 4          # batch, points, feature channels
    L, growth = 3, 8            # num_fc_layers (>2), growth_rate
    K, radius = 8, 0.8          # knn, ball-query radius

    k_x, k_pos, k_par = jax.random.split(key, 3)
    x = jax.random.normal(k_x, (B, N, d), jnp.float32)
    pos = jax.random.uniform(k_pos, (B, N, 3), jnp.float32)  # unit cube: dense neighborhoods

    # Deterministic parameters (layer_first, middle layers..., layer_last).
    in_dims = [3 * d] + [d + i * growth for i in range(1, L - 1)] + [d + (L - 1) * growth]
    params = []
    for cin in in_dims:
        k_w, k_b, k_par = jax.random.split(k_par, 3)
        w = jax.random.uniform(k_w, (cin, growth), jnp.float32, -0.2, 0.2)
        b = jax.random.uniform(k_b, (growth,), jnp.float32, -0.2, 0.2)
        params.append((w, b))

    ref = reference_forward(x, pos, params, knn=K, radius=radius)

    # f32 path: tight check against the pure-JAX reference.
    out_f32 = dense_edge_conv_forward(x, pos, params, knn=K, radius=radius,
                                      compute_dtype=jnp.float32)
    out_f32 = jax.block_until_ready(out_f32)
    assert out_f32.shape == (B, N, d + L * growth), out_f32.shape
    assert jnp.allclose(out_f32, ref, atol=1e-4, rtol=1e-4), \
        float(jnp.max(jnp.abs(out_f32 - ref)))

    # Default fast path: bf16 streaming of neighbors/weights (f32 accumulation).
    # Tolerance loosened only because inputs/weights are bf16-rounded vs the f32 reference.
    out_bf16 = dense_edge_conv_forward(x, pos, params, knn=K, radius=radius)
    out_bf16 = jax.block_until_ready(out_bf16)
    assert out_bf16.shape == (B, N, d + L * growth), out_bf16.shape
    assert jnp.allclose(out_bf16, ref, atol=5e-2, rtol=5e-2), \
        float(jnp.max(jnp.abs(out_bf16 - ref)))

    print("KERNEL_OK")
</pallas_src>

<mosaic_0001>
module attributes {stable_mosaic.version = 11 : i64} {
  func.func @kernel(%arg0: i32, %arg1: memref<32x8x4xf32, #tpu.memory_space<vmem>>, %arg2: memref<32x4xf32, #tpu.memory_space<vmem>>, %arg3: memref<32x8xf32, #tpu.memory_space<vmem>>, %arg4: memref<4x384xf32, #tpu.memory_space<vmem>>, %arg5: memref<1x384xf32, #tpu.memory_space<vmem>>, %arg6: memref<32x28xf32, #tpu.memory_space<vmem>>) attributes {dimension_semantics = [#tpu.dimension_semantics<parallel>], iteration_bounds = array<i64: 1>, scalar_prefetch = 0 : i64, scratch_operands = 0 : i64, tpu.core_type = #tpu.core_type<tc>, window_params = [{transform_indices = @transform_0, window_bounds = array<i64: 32, 8, 4>}, {transform_indices = @transform_1, window_bounds = array<i64: 32, 4>}, {pipeline_mode = #tpu.pipeline_mode<synchronous>, transform_indices = @transform_2, window_bounds = array<i64: 32, 8>}, {pipeline_mode = #tpu.pipeline_mode<synchronous>, transform_indices = @transform_3, window_bounds = array<i64: 4, 384>}, {pipeline_mode = #tpu.pipeline_mode<synchronous>, transform_indices = @transform_4, window_bounds = array<i64: 1, 384>}, {transform_indices = @transform_5, window_bounds = array<i64: 32, 28>}]} {
    %c0 = arith.constant 0 : index
    %c0_0 = arith.constant 0 : index
    %c0_1 = arith.constant 0 : index
    %0 = vector.load %arg1[%c0, %c0_0, %c0_1] : memref<32x8x4xf32, #tpu.memory_space<vmem>>, vector<32x8x4xf32>
    %1 = vector.shape_cast %0 : vector<32x8x4xf32> to vector<256x4xf32>
    %c0_2 = arith.constant 0 : index
    %c0_3 = arith.constant 0 : index
    %2 = vector.load %arg2[%c0_2, %c0_3] : memref<32x4xf32, #tpu.memory_space<vmem>>, vector<32x4xf32>
    %c0_4 = arith.constant 0 : index
    %c0_5 = arith.constant 0 : index
    %3 = vector.load %arg3[%c0_4, %c0_5] : memref<32x8xf32, #tpu.memory_space<vmem>>, vector<32x8xf32>
    %c0_6 = arith.constant 0 : index
    %c0_7 = arith.constant 0 : index
    %4 = vector.load %arg4[%c0_6, %c0_7] : memref<4x384xf32, #tpu.memory_space<vmem>>, vector<4x384xf32>
    %cst = arith.constant dense<0.000000e+00> : vector<32x384xf32>
    %5 = tpu.matmul %2, %4, %cst {dimension_numbers = #tpu.dot_dimension_numbers<[1], [0], [0], [1], [0, 0, 1, 1], [], []>} : vector<32x4xf32>, vector<4x384xf32>, vector<32x384xf32> -> vector<32x384xf32>
    %c0_8 = arith.constant 0 : index
    %c0_9 = arith.constant 0 : index
    %6 = vector.load %arg5[%c0_8, %c0_9] : memref<1x384xf32, #tpu.memory_space<vmem>>, vector<1x384xf32>
    %7 = vector.broadcast %6 : vector<1x384xf32> to vector<32x384xf32>
    %8 = arith.addf %5, %7 : vector<32x384xf32>
    %9 = vector.extract_strided_slice %3 {offsets = [0, 0], sizes = [4, 8], strides = [1, 1]} : vector<32x8xf32> to vector<4x8xf32>
    %cst_10 = arith.constant dense<0.000000e+00> : vector<256x8xf32>
    %10 = tpu.matmul %1, %9, %cst_10 {dimension_numbers = #tpu.dot_dimension_numbers<[1], [0], [0], [1], [0, 0, 1, 1], [], []>} : vector<256x4xf32>, vector<4x8xf32>, vector<256x8xf32> -> vector<256x8xf32>
    %11 = vector.shape_cast %10 : vector<256x8xf32> to vector<32x8x8xf32>
    %12 = vector.extract_strided_slice %8 {offsets = [0, 0], sizes = [32, 8], strides = [1, 1]} : vector<32x384xf32> to vector<32x8xf32>
    %13 = vector.shape_cast %12 : vector<32x8xf32> to vector<32x1x8xf32>
    %14 = vector.broadcast %13 : vector<32x1x8xf32> to vector<32x8x8xf32>
    %15 = arith.addf %11, %14 : vector<32x8x8xf32>
    %cst_11 = arith.constant 0.000000e+00 : f32
    %16 = vector.broadcast %cst_11 : f32 to vector<32x8x8xf32>
    %17 = arith.maximumf %15, %16 : vector<32x8x8xf32>
    %18 = vector.shape_cast %17 : vector<32x8x8xf32> to vector<256x8xf32>
    %19 = vector.extract_strided_slice %3 {offsets = [8, 0], sizes = [8, 8], strides = [1, 1]} : vector<32x8xf32> to vector<8x8xf32>
    %cst_12 = arith.constant dense<0.000000e+00> : vector<256x8xf32>
    %20 = tpu.matmul %18, %19, %cst_12 {dimension_numbers = #tpu.dot_dimension_numbers<[1], [0], [0], [1], [0, 0, 1, 1], [], []>} : vector<256x8xf32>, vector<8x8xf32>, vector<256x8xf32> -> vector<256x8xf32>
    %21 = vector.shape_cast %20 : vector<256x8xf32> to vector<32x8x8xf32>
    %22 = vector.extract_strided_slice %8 {offsets = [0, 128], sizes = [32, 8], strides = [1, 1]} : vector<32x384xf32> to vector<32x8xf32>
    %23 = vector.shape_cast %22 : vector<32x8xf32> to vector<32x1x8xf32>
    %24 = vector.broadcast %23 : vector<32x1x8xf32> to vector<32x8x8xf32>
    %25 = arith.addf %21, %24 : vector<32x8x8xf32>
    %cst_13 = arith.constant 0.000000e+00 : f32
    %26 = vector.broadcast %cst_13 : f32 to vector<32x8x8xf32>
    %27 = arith.maximumf %25, %26 : vector<32x8x8xf32>
    %28 = vector.shape_cast %27 : vector<32x8x8xf32> to vector<256x8xf32>
    %29 = vector.extract_strided_slice %3 {offsets = [16, 0], sizes = [8, 8], strides = [1, 1]} : vector<32x8xf32> to vector<8x8xf32>
    %cst_14 = arith.constant dense<0.000000e+00> : vector<256x8xf32>
    %30 = tpu.matmul %28, %29, %cst_14 {dimension_numbers = #tpu.dot_dimension_numbers<[1], [0], [0], [1], [0, 0, 1, 1], [], []>} : vector<256x8xf32>, vector<8x8xf32>, vector<256x8xf32> -> vector<256x8xf32>
    %31 = vector.extract_strided_slice %3 {offsets = [24, 0], sizes = [8, 8], strides = [1, 1]} : vector<32x8xf32> to vector<8x8xf32>
    %cst_15 = arith.constant dense<0.000000e+00> : vector<256x8xf32>
    %32 = tpu.matmul %18, %31, %cst_15 {dimension_numbers = #tpu.dot_dimension_numbers<[1], [0], [0], [1], [0, 0, 1, 1], [], []>} : vector<256x8xf32>, vector<8x8xf32>, vector<256x8xf32> -> vector<256x8xf32>
    %33 = arith.addf %30, %32 : vector<256x8xf32>
    %34 = vector.shape_cast %33 : vector<256x8xf32> to vector<32x8x8xf32>
    %35 = vector.extract_strided_slice %8 {offsets = [0, 256], sizes = [32, 8], strides = [1, 1]} : vector<32x384xf32> to vector<32x8xf32>
    %36 = vector.shape_cast %35 : vector<32x8xf32> to vector<32x1x8xf32>
    %37 = vector.broadcast %36 : vector<32x1x8xf32> to vector<32x8x8xf32>
    %38 = arith.addf %34, %37 : vector<32x8x8xf32>
    %39 = vector.shape_cast %38 : vector<32x8x8xf32> to vector<256x8xf32>
    %40 = vector.shape_cast %39 : vector<256x8xf32> to vector<32x8x8xf32>
    %cst_16 = arith.constant dense<0xFF800000> : vector<32x8xf32>
    %41 = vector.multi_reduction <maximumf>, %40, %cst_16 [1] : vector<32x8x8xf32> to vector<32x8xf32>
    %42 = vector.shape_cast %28 : vector<256x8xf32> to vector<32x8x8xf32>
    %cst_17 = arith.constant dense<0xFF800000> : vector<32x8xf32>
    %43 = vector.multi_reduction <maximumf>, %42, %cst_17 [1] : vector<32x8x8xf32> to vector<32x8xf32>
    %44 = vector.shape_cast %18 : vector<256x8xf32> to vector<32x8x8xf32>
    %cst_18 = arith.constant dense<0xFF800000> : vector<32x8xf32>
    %45 = vector.multi_reduction <maximumf>, %44, %cst_18 [1] : vector<32x8x8xf32> to vector<32x8xf32>
    %46 = tpu.concatenate %41, %43, %45, %2 in 1 : vector<32x8xf32>, vector<32x8xf32>, vector<32x8xf32>, vector<32x4xf32> -> vector<32x28xf32>
    %c0_19 = arith.constant 0 : index
    %c0_20 = arith.constant 0 : index
    %47 = vector.load %arg6[%c0_19, %c0_20] : memref<32x28xf32, #tpu.memory_space<vmem>>, vector<32x28xf32>
    tpu.vector_store %arg6[%c0_19, %c0_20], %46 {strides = array<i32>} : memref<32x28xf32, #tpu.memory_space<vmem>>, vector<32x28xf32>,
    return
  }
  func.func @transform_0(%arg0: i32) -> (i32, i32, i32) {
    %c0_i32 = arith.constant 0 : i32
    %c0_i32_0 = arith.constant 0 : i32
    %c0_i32_1 = arith.constant 0 : i32
    return %arg0, %c0_i32, %c0_i32_0 : i32, i32, i32
  }
  func.func @transform_1(%arg0: i32) -> (i32, i32) {
    %c0_i32 = arith.constant 0 : i32
    %c0_i32_0 = arith.constant 0 : i32
    return %arg0, %c0_i32 : i32, i32
  }
  func.func @transform_2(%arg0: i32) -> (i32, i32) {
    %c0_i32 = arith.constant 0 : i32
    %c0_i32_0 = arith.constant 0 : i32
    %c0_i32_1 = arith.constant 0 : i32
    return %c0_i32, %c0_i32_0 : i32, i32
  }
  func.func @transform_3(%arg0: i32) -> (i32, i32) {
    %c0_i32 = arith.constant 0 : i32
    %c0_i32_0 = arith.constant 0 : i32
    %c0_i32_1 = arith.constant 0 : i32
    return %c0_i32, %c0_i32_0 : i32, i32
  }
  func.func @transform_4(%arg0: i32) -> (i32, i32) {
    %c0_i32 = arith.constant 0 : i32
    %c0_i32_0 = arith.constant 0 : i32
    %c0_i32_1 = arith.constant 0 : i32
    return %c0_i32, %c0_i32_0 : i32, i32
  }
  func.func @transform_5(%arg0: i32) -> (i32, i32) {
    %c0_i32 = arith.constant 0 : i32
    %c0_i32_0 = arith.constant 0 : i32
    return %arg0, %c0_i32 : i32, i32
  }
}

</mosaic_0001>

<bundles_post_ra>
// kernel: tpu_custom_call.1
= control target key start
LH: loop header
LB: loop body
LE: loop exit
PB: predicated region body
PF: predicated region fallthrough
CT: control target
= control target key end

     0   :  { %vm96_vm0 = vcmask 1043456   ;;  %vm83_vm1 = vcmask 31744   ;;  %v4196_v3 = vmov 0.0   ;;  %s5249_s0 = inlined_call_operand.vmem [shape: f32[32,8,4], index: 0, kind: input, shape index: {}]   ;;  %s5250_s1 = inlined_call_operand.vmem [shape: f32[32,4], index: 1, kind: input, shape index: {}]   ;;  %s5251_s2 = inlined_call_operand.vmem [shape: f32[32,8], index: 2, kind: input, shape index: {}]   ;;  %s5252_s3 = inlined_call_operand.vmem [shape: f32[4,384], index: 3, kind: input, shape index: {}]   ;;  %s5253_s4 = inlined_call_operand.vmem [shape: f32[1,384], index: 4, kind: input, shape index: {}]   ;;  %s5254_s5 = inlined_call_operand.hbm [shape: f32[32,28], index: 5, kind: output, shape index: {}]  }
   0x1   :  { %v61_v0 = vld [vmem:[%s5252_s3] sm:$0xff]  ;;  %167 = vmatprep.mubr.f32.mxu0 %v4196_v3  ;;  %v62_v5 = vld [vmem:[%s5252_s3 + $0x8] sm:$0xf]  ;;  %v55_v7 = vld [vmem:[%s5250_s1 + $0x10] sm:$0xff] }
   0x2   :  { %v4239_v1 = vld [vmem:[%s5250_s1] sm:$0xff]  ;;  %v82_v2 = vcombine.high %v61_v0, %v61_v0  ;;  %3920 = vmatprep.subr.msk.mxu1 %vm96_vm0, %v62_v5  ;;  %v4260_v6 = vld [vmem:[%s5250_s1 + $0x8] sm:$0xff]  ;;  %v51_v8 = vld [vmem:[%s5249_s0 + $0xf0] sm:$0xff] }
   0x3   :  { %3922 = vmatprep.mubr.msk.f32.mxu1 %vm83_vm1, %v4239_v1  ;;  %v57_v4 = vld [vmem:[%s5251_s2] sm:$0xff]  ;;  %3921 = vmatpush3.msk.msra.mxu1 %vm96_vm0, %v62_v5  ;;  %v56_v9 = vld [vmem:[%s5250_s1 + $0x18] sm:$0xff]  ;;  %v58_v11 = vld [vmem:[%s5251_s2 + $0x8] sm:$0xff] }
   0x4   :  { %3643 = vmatprep.subr.msk.mxu0 %vm96_vm0, %v82_v2  ;;  %3923 = vmatmul.mubr.msk.f32.vlgmr.msra.gmra.mrb[0].mxu1 %vm83_vm1, %v4260_v6  ;;  %v52_v10 = vld [vmem:[%s5249_s0 + $0xf8] sm:$0xff] }
   0x5   :  { %3644 = vmatpush1.msk.msra.mxu0 %vm96_vm0, %v61_v0  ;;  %4128 = vmatprep.subr.msk.mxu1 %vm96_vm0, %v57_v4 }
   0x6   :  { %3645 = vmatmul.mubr.msk.f32.vlgmr.msra.gmra.mrb[0].mxu0 %vm83_vm1, %v4239_v1  ;;  %3928 = vmatprep.subr.msk.mxu0 %vm96_vm0, %v57_v4 }
   0x7   :  { %3929 = vmatpush3.msk.msra.mxu0 %vm96_vm0, %v57_v4  ;;  %173 = vmatprep.mubr.f32.mxu0 %v4196_v3 }
   0x8   :  { %3925 = vmatprep.mubr.msk.f32.mxu1 %vm83_vm1, %v55_v7  ;;  %4129 = vmatpush3.msk.msra.mxu1 %vm96_vm0, %v57_v4 }
   0x9   :  { %3926 = vmatmul.mubr.msk.f32.gmra.mrb[2].mxu1 %vm83_vm1, %v56_v9 }
   0xa   :  { %3646 = vmatmul.mubr.msk.f32.gmra.mrb[2].mxu0 %vm83_vm1, %v4260_v6  ;;  %3975 = vmatprep.mubr.msk.f32.mxu1 %vm83_vm1, %v51_v8 }
   0xb   :  { %179 = vmatprep.mubr.f32.mxu0 %v4196_v3 }
   0xe   :  { %3647 = vmatmul.mubr.msk.f32.gmra.mrb[4].mxu0 %vm83_vm1, %v55_v7 }
   0xf   :  { %10 = vsyncpa [#allocation3], 0  ;;  %185 = vmatprep.mubr.f32.mxu0 %v4196_v3  ;;  %3978 = vmatprep.subr.mxu0 %v58_v11  ;;  %v21_v12 = vld [vmem:[%s5249_s0] sm:$0xff]  ;;  %v22_v13 = vld [vmem:[%s5249_s0 + $0x8] sm:$0xff]  ;;  %s4197_s22 = smov 24   ;;  %v65_v43 = vlaneseq  ;;  %vm1025_vm2 = vcmask 64512  }
  0x10   :  { %3976 = vmatmul.mubr.msk.f32.vlgmr.msra.gmra.mrb[4].mxu1 %vm83_vm1, %v52_v10  ;;  %v23_v14 = vld [vmem:[%s5249_s0 + $0x10] sm:$0xff]  ;;  %v24_v15 = vld [vmem:[%s5249_s0 + $0x18] sm:$0xff]  ;;  %v25_v16 = vld [vmem:[%s5249_s0 + $0x20] sm:$0xff]  ;;  %3596 = vrot.lane.b32.xlu0 %v4239_v1, %s4197_s22  ;;  %v4198_v45 = vmov 1966171168   ;;  %vm3413_vm3 = vcmask 1041409  }
  0x11   :  { %v26_v17 = vld [vmem:[%s5249_s0 + $0x28] sm:$0xff]  ;;  %v27_v18 = vld [vmem:[%s5249_s0 + $0x30] sm:$0xff]  ;;  %v28_v19 = vld [vmem:[%s5249_s0 + $0x38] sm:$0xff]  ;;  %3598 = vrot.lane.b32.xlu1 %v4260_v6, %s4197_s22  ;;  %v66_v44 = vshrl.u32 %v65_v43, 7  ;;  %v607_v46 = vunpack.c.l.s4 %v4198_v45  ;;  %vm3415_vm4 = vcmask 1042434   ;;  %vm3417_vm5 = vcmask 1043459  }
  0x12   :  { %3648 = vmatmul.mubr.msk.f32.gmra.mrb[6].mxu0 %vm83_vm1, %v56_v9  ;;  %v29_v20 = vld [vmem:[%s5249_s0 + $0x40] sm:$0xff]  ;;  %v30_v21 = vld [vmem:[%s5249_s0 + $0x48] sm:$0xff]  ;;  %v31_v22 = vld [vmem:[%s5249_s0 + $0x50] sm:$0xff]  ;;  %vm3419_vm6 = vcmask 1044484   ;;  %vm3421_vm7 = vcmask 1045509   ;;  %vm3423_vm8 = vcmask 1046534  }
  0x13   :  { %3930 = vmatprep.mubr.msk.f32.mxu0 %vm83_vm1, %v21_v12  ;;  %v32_v23 = vld [vmem:[%s5249_s0 + $0x58] sm:$0xff]  ;;  %v33_v24 = vld [vmem:[%s5249_s0 + $0x60] sm:$0xff]  ;;  %v34_v25 = vld [vmem:[%s5249_s0 + $0x68] sm:$0xff]  ;;  %v4416_v47 = vsub.s32 0, %v66_v44  ;;  %v608_v49 = vunpack.c.0.s8 %v607_v46  ;;  %v75_v60 = vsub.s32 2, %v66_v44  ;;  %v71_v0 = vsub.s32 1, %v66_v44 }
  0x14   :  { %v35_v26 = vld [vmem:[%s5249_s0 + $0x70] sm:$0xff]  ;;  %v36_v27 = vld [vmem:[%s5249_s0 + $0x78] sm:$0xff]  ;;  %v37_v28 = vld [vmem:[%s5249_s0 + $0x80] sm:$0xff]  ;;  %vm3425_vm9 = vcmask 1047559   ;;  %s4200_s25 = smov 8   ;;  %vm3612_vm10 = vcmask 130048  }
  0x15   :  { %v38_v29 = vld [vmem:[%s5249_s0 + $0x88] sm:$0xff]  ;;  %v39_v30 = vld [vmem:[%s5249_s0 + $0x90] sm:$0xff]  ;;  %v40_v31 = vld [vmem:[%s5249_s0 + $0x98] sm:$0xff]  ;;  %v4422_v51 = vsub.s32 %v608_v49, %v66_v44  ;;  %vm3617_vm11 = vcmask 195584   ;;  %vm3622_vm12 = vcmask 228352  }
  0x16   :  { %3931 = vmatmul.mubr.msk.f32.vlgmr.msra.gmra.mrb[8].mxu0 %vm83_vm1, %v22_v13  ;;  %v41_v32 = vld [vmem:[%s5249_s0 + $0xa0] sm:$0xff]  ;;  %v42_v33 = vld [vmem:[%s5249_s0 + $0xa8] sm:$0xff]  ;;  %v43_v34 = vld [vmem:[%s5249_s0 + $0xb0] sm:$0xff] }
  0x17   :  { %3933 = vmatprep.mubr.msk.f32.mxu0 %vm83_vm1, %v23_v14  ;;  %3979 = vmatpush3.msra.mxu0 %v58_v11  ;;  %v44_v35 = vld [vmem:[%s5249_s0 + $0xb8] sm:$0xff]  ;;  %v45_v36 = vld [vmem:[%s5249_s0 + $0xc0] sm:$0xff]  ;;  %v46_v37 = vld [vmem:[%s5249_s0 + $0xc8] sm:$0xff] }
  0x18   :  { %v47_v38 = vld [vmem:[%s5249_s0 + $0xd0] sm:$0xff]  ;;  %v48_v39 = vld [vmem:[%s5249_s0 + $0xd8] sm:$0xff]  ;;  %v49_v40 = vld [vmem:[%s5249_s0 + $0xe0] sm:$0xff] }
  0x19   :  { %v50_v41 = vld [vmem:[%s5249_s0 + $0xe8] sm:$0xff]  ;;  %v60_v42 = vld [vmem:[%s5251_s2 + $0x18] sm:$0xff]  ;;  %v63_v48 = vld [vmem:[%s5253_s4] sm:$0x7] }
  0x1a   :  { %3934 = vmatmul.mubr.msk.f32.gmra.mrb[10].mxu0 %vm83_vm1, %v24_v15  ;;  %4028 = vmatprep.subr.mxu1 %v60_v42  ;;  %v68_v50 = vrot.slane %v63_v48, %v4416_v47  ;;  %v4437_v4 = vrot.slane %v63_v48, %v75_v60  ;;  %v4444_v9 = vrot.slane %v63_v48, %v71_v0 }
  0x1b   :  { %3936 = vmatprep.mubr.msk.f32.mxu0 %vm83_vm1, %v25_v16  ;;  %4029 = vmatpush3.msra.mxu1 %v60_v42 }
  0x1e   :  { %3937 = vmatmul.mubr.msk.f32.gmra.mrb[12].mxu0 %vm83_vm1, %v26_v17 }
  0x1f   :  { %3939 = vmatprep.mubr.msk.f32.mxu0 %vm83_vm1, %v27_v18 }
  0x22   :  { %3940 = vmatmul.mubr.msk.f32.gmra.mrb[14].mxu0 %vm83_vm1, %v28_v19 }
  0x23   :  { %3942 = vmatprep.mubr.msk.f32.mxu0 %vm83_vm1, %v29_v20 }
  0x26   :  { %3943 = vmatmul.mubr.msk.f32.gmra.mrb[16].mxu0 %vm83_vm1, %v30_v21 }
  0x27   :  { %3945 = vmatprep.mubr.msk.f32.mxu0 %vm83_vm1, %v31_v22 }
  0x2a   :  { %3946 = vmatmul.mubr.msk.f32.gmra.mrb[18].mxu0 %vm83_vm1, %v32_v23 }
  0x2b   :  { %3948 = vmatprep.mubr.msk.f32.mxu0 %vm83_vm1, %v33_v24 }
  0x2e   :  { %3949 = vmatmul.mubr.msk.f32.gmra.mrb[20].mxu0 %vm83_vm1, %v34_v25 }
  0x2f   :  { %3951 = vmatprep.mubr.msk.f32.mxu0 %vm83_vm1, %v35_v26 }
  0x32   :  { %3952 = vmatmul.mubr.msk.f32.gmra.mrb[22].mxu0 %vm83_vm1, %v36_v27 }
  0x33   :  { %3954 = vmatprep.mubr.msk.f32.mxu0 %vm83_vm1, %v37_v28 }
  0x36   :  { %3955 = vmatmul.mubr.msk.f32.gmra.mrb[24].mxu0 %vm83_vm1, %v38_v29 }
  0x37   :  { %3957 = vmatprep.mubr.msk.f32.mxu0 %vm83_vm1, %v39_v30 }
  0x3a   :  { %3958 = vmatmul.mubr.msk.f32.gmra.mrb[26].mxu0 %vm83_vm1, %v40_v31 }
  0x3b   :  { %3960 = vmatprep.mubr.msk.f32.mxu0 %vm83_vm1, %v41_v32 }
  0x3e   :  { %3961 = vmatmul.mubr.msk.f32.gmra.mrb[28].mxu0 %vm83_vm1, %v42_v33 }
  0x3f   :  { %3963 = vmatprep.mubr.msk.f32.mxu0 %vm83_vm1, %v43_v34 }
  0x42   :  { %3964 = vmatmul.mubr.msk.f32.gmra.mrb[30].mxu0 %vm83_vm1, %v44_v35 }
  0x43   :  { %3966 = vmatprep.mubr.msk.f32.mxu0 %vm83_vm1, %v45_v36 }
  0x46   :  { %3967 = vmatmul.mubr.msk.f32.gmra.mrb[32].mxu0 %vm83_vm1, %v46_v37 }
  0x47   :  { %3969 = vmatprep.mubr.msk.f32.mxu0 %vm83_vm1, %v47_v38 }
  0x4a   :  { %3970 = vmatmul.mubr.msk.f32.gmra.mrb[34].mxu0 %vm83_vm1, %v48_v39 }
  0x4b   :  { %3972 = vmatprep.mubr.msk.f32.mxu0 %vm83_vm1, %v49_v40 }
  0x4e   :  { %3973 = vmatmul.mubr.msk.f32.gmra.mrb[36].mxu0 %vm83_vm1, %v50_v41 }
  0xd7   :  { %v4426_v55 = vpop.f32.mrb[0].mxu1 }
  0xd8   :  { %v4429_v57 = vpop.f32.mrb[1].mxu1 }
  0xd9   :  { %v169_v52 = vpop.f32.mrb[0].mxu0 }
  0xda   :  { %v170_v53 = vadd.f32 %v169_v52, %v68_v50  ;;  %v4424_v54 = vpop.f32.mrb[1].mxu0 }
  0xdc   :  { %v612_v56 = vrot.slane %v170_v53, %v4422_v51  ;;  %v3927_v61 = vpop.f32.mrb[2].mxu1  ;;  %v605_v8 = vcombine.high %v170_v53, %v170_v53 }
  0xdd   :  { %v175_v58 = vpop.f32.mrb[2].mxu0  ;;  %v4433_v63 = vpop.f32.mrb[3].mxu1  ;;  %v4448_v12 = vadd.f32 %v3927_v61, %v4437_v4 }
  0xde   :  { %v4431_v59 = vpop.f32.mrb[3].mxu0  ;;  %v620_v62 = vcombine.high %v612_v56, %v612_v56  ;;  %v176_v3 = vadd.f32 %v175_v58, %v68_v50  ;;  %v628_v11 = vrot.slane %v612_v56, %v4422_v51  ;;  %v619_v21 = vrot.slane %v605_v8, %v4422_v51 }
  0xe0   :  { %v642_v6 = vrot.slane %v620_v62, %v4422_v51  ;;  %v654_v15 = vcombine.high %v176_v3, %v176_v3  ;;  %v4454_v17 = vrot.slane %v176_v3, %v4422_v51  ;;  %v804_v24 = vrot.slane %v628_v11, %v4416_v47 }
  0xe1   :  { %v181_v1 = vpop.f32.mrb[4].mxu0  ;;  %v650_v25 = vcombine.high %v628_v11, %v628_v11  ;;  %v621_v39 = vcombine.high %v619_v21, %v619_v21  ;;  %v4476_v44 = vrot.slane %v619_v21, %v4422_v51 }
  0xe2   :  { %v4435_v2 = vpop.f32.mrb[5].mxu0  ;;  %v808_v19 = vrot.slane %v642_v6, %v4416_v47  ;;  %v652_v20 = vcombine.high %v642_v6, %v642_v6  ;;  %v4458_v22 = vadd.f32 %v181_v1, %v68_v50  ;;  %v4463_v29 = vrot.slane %v654_v15, %v4422_v51 }
  0xe3   :  { %v4439_v5 = vpop.f32.mrb[4].mxu1  ;;  %v669_v31 = vcombine.high %v4454_v17, %v4454_v17  ;;  %v812_v38 = vrot.slane %v650_v25, %v4416_v47  ;;  %v4496_v0 = vrot.slane %v621_v39, %v4422_v51 }
  0xe4   :  { %v4442_v7 = vpop.f32.mrb[5].mxu1  ;;  %v816_v34 = vrot.slane %v652_v20, %v4416_v47  ;;  %v703_v35 = vcombine.high %v4458_v22, %v4458_v22 }
  0xe5   :  { %v187_v10 = vpop.f32.mrb[6].mxu0  ;;  %v824_v20 = vrot.slane %v4496_v0, %v4416_v47 }
  0xe6   :  { %v188_v13 = vadd.f32 %v187_v10, %v68_v50  ;;  %v189_v14 = vpop.f32.mrb[7].mxu0  ;;  %v4486_v50 = vrot.slane %v4458_v22, %v4422_v51  ;;  %v820_v10 = vrot.slane %v4476_v44, %v4416_v47  ;;  %v653_v22 = vcombine.high %v4496_v0, %v4496_v0 }
  0xe7   :  { %v4451_v16 = vadd.f32 %v189_v14, %v4444_v9  ;;  %v691_v0 = vrot.slane %v669_v31, %v4422_v51 }
  0xe8   :  { %v752_v18 = vcombine.high %v188_v13, %v188_v13  ;;  %v4489_v52 = vrot.slane %v188_v13, %v4422_v51 }
  0xe9   :  { %v3932_v23 = vpop.f32.mrb[8].mxu0 }
  0xea   :  { %v766_v26 = vrot.slane %v752_v18, %v4422_v51  ;;  %v962_v27 = vadd.f32 %v3932_v23, %v808_v19  ;;  %v442_v28 = vpop.f32.mrb[9].mxu0 }
  0xeb   :  { %v961_v30 = vadd.f32 %v804_v24, %v442_v28 }
  0xec   :  { %v768_v32 = vcombine.high %v766_v26, %v766_v26  ;;  %v994_v33 = vmax.f32 %v962_v27, 0.0  ;;  %v4473_v43 = vrot.slane %v766_v26, %v4422_v51 }
  0xed   :  { %v993_v36 = vmax.f32 %v961_v30, 0.0  ;;  %v3935_v37 = vpop.f32.mrb[10].mxu0 }
  0xee   :  { %v3164_v40 = vsel %vm1025_vm2, %v994_v33, -inf  ;;  %v964_v41 = vadd.f32 %v3935_v37, %v816_v34  ;;  %v452_v42 = vpop.f32.mrb[11].mxu0  ;;  %v4482_v49 = vrot.slane %v768_v32, %v4422_v51  ;;  %v798_v6 = vcombine.high %v4473_v43, %v4473_v43 }
  0xef   :  { %v3165_v45 = vrot.slane %v3164_v40, 4  ;;  %v3157_v46 = vsel %vm1025_vm2, %v993_v36, -inf  ;;  %v963_v48 = vadd.f32 %v812_v38, %v452_v42  ;;  %3980 = vmatprep.mubr.msk.f32.mxu0 %vm1025_vm2, %v993_v36  ;;  %4030 = vmatprep.mubr.msk.f32.mxu1 %vm1025_vm2, %v993_v36 }
  0xf0   :  { %v3158_v53 = vrot.slane %v3157_v46, 4  ;;  %v996_v56 = vmax.f32 %v964_v41, 0.0  ;;  %3981 = vmatmul.mubr.msk.f32.vlgmr.msra.gmra.mrb[38].mxu0 %vm1025_vm2, %v994_v33  ;;  %4031 = vmatmul.mubr.msk.f32.vlgmr.msra.gmra.mrb[6].mxu1 %vm1025_vm2, %v994_v33  ;;  %v800_v61 = vcombine.high %v4482_v49, %v4482_v49  ;;  %v924_v21 = vrot.slane %v798_v6, %v4416_v47 }
  0xf1   :  { %v3166_v58 = vmax.f32 %v3164_v40, %v3165_v45  ;;  %v995_v60 = vmax.f32 %v963_v48, 0.0  ;;  %v3938_v62 = vpop.f32.mrb[12].mxu0 }
  0xf2   :  { %v3159_v1 = vmax.f32 %v3157_v46, %v3158_v53  ;;  %v3178_v3 = vsel %vm1025_vm2, %v996_v56, -inf  ;;  %v462_v8 = vpop.f32.mrb[13].mxu0  ;;  %v928_v15 = vrot.slane %v800_v61, %v4416_v47  ;;  %v966_v32 = vadd.f32 %v3938_v62, %v824_v20 }
  0xf3   :  { %v3167_v11 = vrot.slane %v3166_v58, 2  ;;  %v3179_v13 = vrot.slane %v3178_v3, 4  ;;  %v3171_v14 = vsel %vm1025_vm2, %v995_v60, -inf  ;;  %3983 = vmatprep.mubr.msk.f32.mxu0 %vm1025_vm2, %v995_v60  ;;  %4033 = vmatprep.mubr.msk.f32.mxu1 %vm1025_vm2, %v995_v60  ;;  %v965_v26 = vadd.f32 %v820_v10, %v462_v8 }
  0xf4   :  { %v3160_v18 = vrot.slane %v3159_v1, 2  ;;  %v3172_v19 = vrot.slane %v3171_v14, 4  ;;  %3984 = vmatmul.mubr.msk.f32.gmra.mrb[40].mxu0 %vm1025_vm2, %v996_v56  ;;  %4034 = vmatmul.mubr.msk.f32.gmra.mrb[8].mxu1 %vm1025_vm2, %v996_v56  ;;  %v992_v25 = vadd.f32 %v4439_v5, %v928_v15  ;;  %v991_v33 = vadd.f32 %v924_v21, %v4442_v7 }
  0xf5   :  { %v3168_v23 = vmax.f32 %v3166_v58, %v3167_v11  ;;  %v3180_v24 = vmax.f32 %v3178_v3, %v3179_v13  ;;  %v3941_v27 = vpop.f32.mrb[14].mxu0  ;;  %v997_v39 = vmax.f32 %v965_v26, 0.0  ;;  %v998_v42 = vmax.f32 %v966_v32, 0.0 }
  0xf6   :  { %v3161_v28 = vmax.f32 %v3159_v1, %v3160_v18  ;;  %v3173_v30 = vmax.f32 %v3171_v14, %v3172_v19  ;;  %v472_v34 = vpop.f32.mrb[15].mxu0  ;;  %v4514_v38 = vmax.f32 %v992_v25, 0.0  ;;  %v4516_v45 = vmax.f32 %v991_v33, 0.0 }
  0xf7   :  { %v3169_v36 = vrot.slane %v3168_v23, 1  ;;  %v3181_v37 = vrot.slane %v3180_v24, 2  ;;  %v3185_v53 = vsel %vm1025_vm2, %v997_v39, -inf  ;;  %3986 = vmatprep.mubr.msk.f32.mxu0 %vm1025_vm2, %v997_v39  ;;  %4036 = vmatprep.mubr.msk.f32.mxu1 %vm1025_vm2, %v997_v39  ;;  %v3192_v61 = vsel %vm1025_vm2, %v998_v42, -inf }
  0xf8   :  { %v3162_v40 = vrot.slane %v3161_v28, 1  ;;  %v3174_v41 = vrot.slane %v3173_v30, 2  ;;  %v3374_v48 = vsel %vm1025_vm2, %v4514_v38, -inf  ;;  %3987 = vmatmul.mubr.msk.f32.gmra.mrb[42].mxu0 %vm1025_vm2, %v998_v42  ;;  %4037 = vmatmul.mubr.msk.f32.gmra.mrb[10].mxu1 %vm1025_vm2, %v998_v42  ;;  %v4530_v1 = vrot.slane %v703_v35, %v4422_v51 }
  0xf9   :  { %v3170_v46 = vmax.f32 %v3168_v23, %v3169_v36  ;;  %v3182_v5 = vmax.f32 %v3180_v24, %v3181_v37  ;;  %v3944_v7 = vpop.f32.mrb[16].mxu0  ;;  %v3375_v60 = vrot.slane %v3374_v48, 4  ;;  %v3193_v3 = vrot.slane %v3192_v61, 4 }
  0xfa   :  { %v3163_v56 = vmax.f32 %v3161_v28, %v3162_v40  ;;  %v3175_v58 = vmax.f32 %v3173_v30, %v3174_v41  ;;  %v482_v62 = vpop.f32.mrb[17].mxu0  ;;  %v3367_v6 = vsel %vm1025_vm2, %v4516_v45, -inf  ;;  %v3186_v8 = vrot.slane %v3185_v53, 4 }
  0xfb   :  { %v3183_v11 = vrot.slane %v3182_v5, 1  ;;  %v3368_v14 = vrot.slane %v3367_v6, 4  ;;  %v718_v15 = vcombine.high %v4486_v50, %v4486_v50  ;;  %v3194_v18 = vmax.f32 %v3192_v61, %v3193_v3 }
  0xfc   :  { %v4535_v10 = vsel %vm3413_vm3, %v3170_v46, %v3163_v56  ;;  %v3176_v13 = vrot.slane %v3175_v58, 1  ;;  %v3187_v19 = vmax.f32 %v3185_v53, %v3186_v8  ;;  %v767_v20 = vcombine.high %v4489_v52, %v4489_v52 }
  0xfd   :  { %v3947_v35 = vpop.f32.mrb[18].mxu0  ;;  %v4543_v21 = vmax.f32 %v3374_v48, %v3375_v60  ;;  %v4545_v23 = vmax.f32 %v3367_v6, %v3368_v14  ;;  %v651_v24 = vcombine.high %v4476_v44, %v4476_v44  ;;  %v3195_v26 = vrot.slane %v3194_v18, 2 }
  0xfe   :  { %v492_v25 = vpop.f32.mrb[19].mxu0  ;;  %v3188_v28 = vrot.slane %v3187_v19, 2  ;;  %v832_v30 = vrot.slane %v653_v22, %v4416_v47  ;;  %v4554_v32 = vmax.f32 %v3182_v5, %v3183_v11  ;;  %v4556_v33 = vmax.f32 %v3175_v58, %v3176_v13 }
  0xff   :  { %v828_v36 = vrot.slane %v651_v24, %v4416_v47  ;;  %v677_v37 = vrot.slane %v4454_v17, %v4422_v51  ;;  %v3196_v44 = vmax.f32 %v3194_v18, %v3195_v26  ;;  %v840_v41 = vrot.slane %v691_v0, %v4416_v47 }
 0x100   :  { %v4561_v39 = vmax.f32 %v3187_v19, %v3188_v28  ;;  %v968_v40 = vadd.f32 %v3941_v27, %v832_v30  ;;  %v701_v5 = vcombine.high %v691_v0, %v691_v0  ;;  %v670_v17 = vcombine.high %v4463_v29, %v4463_v29 }
 0x101   :  { %v3950_v42 = vpop.f32.mrb[20].mxu0  ;;  %v967_v48 = vadd.f32 %v828_v36, %v472_v34  ;;  %v836_v31 = vrot.slane %v677_v37, %v4416_v47  ;;  %v970_v60 = vadd.f32 %v3944_v7, %v840_v41  ;;  %v699_v6 = vcombine.high %v677_v37, %v677_v37 }
 0x102   :  { %v4566_v53 = vpop.f32.mrb[21].mxu0  ;;  %v1000_v58 = vmax.f32 %v968_v40, 0.0  ;;  %v848_v3 = vrot.slane %v701_v5, %v4416_v47  ;;  %v3197_v8 = vrot.slane %v3196_v44, 1  ;;  %v3190_v34 = vrot.slane %v4561_v39, 1 }
 0x103   :  { %v999_v61 = vmax.f32 %v967_v48, 0.0  ;;  %v969_v27 = vadd.f32 %v836_v31, %v482_v62  ;;  %v1002_v13 = vmax.f32 %v970_v60, 0.0  ;;  %v844_v28 = vrot.slane %v699_v6, %v4416_v47 }
 0x104   :  { %v3206_v11 = vsel %vm1025_vm2, %v1000_v58, -inf  ;;  %v972_v62 = vadd.f32 %v3947_v35, %v848_v3  ;;  %v698_v30 = vrot.slane %v670_v17, %v4422_v51  ;;  %v4591_v35 = vmax.f32 %v3196_v44, %v3197_v8 }
 0x105   :  { %v4574_v14 = vpop.f32.mrb[22].mxu0  ;;  %v3207_v18 = vrot.slane %v3206_v11, 4  ;;  %v3199_v19 = vsel %vm1025_vm2, %v999_v61, -inf  ;;  %v1001_v7 = vmax.f32 %v969_v27, 0.0  ;;  %3989 = vmatprep.mubr.msk.f32.mxu0 %vm1025_vm2, %v999_v61  ;;  %4039 = vmatprep.mubr.msk.f32.mxu1 %vm1025_vm2, %v999_v61  ;;  %v3220_v26 = vsel %vm1025_vm2, %v1002_v13, -inf }
 0x106   :  { %v4579_v22 = vpop.f32.mrb[23].mxu0  ;;  %v3200_v24 = vrot.slane %v3199_v19, 4  ;;  %3990 = vmatmul.mubr.msk.f32.gmra.mrb[44].mxu0 %vm1025_vm2, %v1000_v58  ;;  %4040 = vmatmul.mubr.msk.f32.gmra.mrb[12].mxu1 %vm1025_vm2, %v1000_v58  ;;  %v3221_v36 = vrot.slane %v3220_v26, 4  ;;  %v1004_v40 = vmax.f32 %v972_v62, 0.0  ;;  %v971_v31 = vadd.f32 %v844_v28, %v492_v25 }
 0x107   :  { %v4586_v0 = vmax.f32 %v3206_v11, %v3207_v18  ;;  %v3213_v37 = vsel %vm1025_vm2, %v1001_v7, -inf  ;;  %3992 = vmatprep.mubr.msk.f32.mxu0 %vm1025_vm2, %v1001_v7  ;;  %4042 = vmatprep.mubr.msk.f32.mxu1 %vm1025_vm2, %v1001_v7  ;;  %v856_v17 = vrot.slane %v698_v30, %v4416_v47  ;;  %v684_v61 = vrot.slane %v4463_v29, %v4422_v51 }
 0x108   :  { %v3201_v41 = vmax.f32 %v3199_v19, %v3200_v24  ;;  %v3214_v48 = vrot.slane %v3213_v37, 4  ;;  %v3222_v58 = vmax.f32 %v3220_v26, %v3221_v36  ;;  %v3234_v60 = vsel %vm1025_vm2, %v1004_v40, -inf }
 0x109   :  { %v4593_v5 = vpop.f32.mrb[24].mxu0  ;;  %v3209_v3 = vrot.slane %v4586_v0, 2  ;;  %v3235_v44 = vrot.slane %v3234_v60, 4  ;;  %v1003_v8 = vmax.f32 %v971_v31, 0.0  ;;  %v974_v11 = vadd.f32 %v3950_v42, %v856_v17 }
 0x10a   :  { %v4599_v27 = vpop.f32.mrb[25].mxu0  ;;  %v3215_v6 = vmax.f32 %v3213_v37, %v3214_v48  ;;  %3993 = vmatmul.mubr.msk.f32.gmra.mrb[46].mxu0 %vm1025_vm2, %v1002_v13  ;;  %4043 = vmatmul.mubr.msk.f32.gmra.mrb[14].mxu1 %vm1025_vm2, %v1002_v13  ;;  %v3223_v25 = vrot.slane %v3222_v58, 2  ;;  %v852_v18 = vrot.slane %v684_v61, %v4416_v47  ;;  %v702_v19 = vcombine.high %v698_v30, %v698_v30 }
 0x10b   :  { %v3202_v7 = vrot.slane %v3201_v41, 2  ;;  %v3236_v24 = vmax.f32 %v3234_v60, %v3235_v44  ;;  %v3227_v29 = vsel %vm1025_vm2, %v1003_v8, -inf  ;;  %3995 = vmatprep.mubr.msk.f32.mxu0 %vm1025_vm2, %v1003_v8  ;;  %4045 = vmatprep.mubr.msk.f32.mxu1 %vm1025_vm2, %v1003_v8  ;;  %v1006_v37 = vmax.f32 %v974_v11, 0.0 }
 0x10c   :  { %v3216_v62 = vrot.slane %v3215_v6, 2  ;;  %v3224_v28 = vmax.f32 %v3222_v58, %v3223_v25  ;;  %v3228_v36 = vrot.slane %v3227_v29, 4  ;;  %v973_v13 = vadd.f32 %v852_v18, %v4566_v53 }
 0x10d   :  { %v4608_v26 = vpop.f32.mrb[26].mxu0  ;;  %v3237_v30 = vrot.slane %v3236_v24, 2  ;;  %v864_v31 = vrot.slane %v702_v19, %v4416_v47  ;;  %v700_v60 = vcombine.high %v684_v61, %v684_v61  ;;  %v3248_v58 = vsel %vm1025_vm2, %v1006_v37, -inf }
 0x10e   :  { %v4611_v42 = vpop.f32.mrb[27].mxu0  ;;  %v3217_v48 = vmax.f32 %v3215_v6, %v3216_v62  ;;  %3996 = vmatmul.mubr.msk.f32.gmra.mrb[48].mxu0 %vm1025_vm2, %v1004_v40  ;;  %4046 = vmatmul.mubr.msk.f32.gmra.mrb[16].mxu1 %vm1025_vm2, %v1004_v40  ;;  %v3225_v17 = vrot.slane %v3224_v28, 1  ;;  %v3229_v44 = vmax.f32 %v3227_v29, %v3228_v36  ;;  %v1005_v8 = vmax.f32 %v973_v13, 0.0 }
 0x10f   :  { %v3238_v11 = vmax.f32 %v3236_v24, %v3237_v30  ;;  %v3249_v53 = vrot.slane %v3248_v58, 4  ;;  %v976_v18 = vadd.f32 %v4574_v14, %v864_v31  ;;  %v860_v61 = vrot.slane %v700_v60, %v4416_v47 }
 0x110   :  { %v3218_v25 = vrot.slane %v3217_v48, 1  ;;  %v3226_v62 = vmax.f32 %v3224_v28, %v3225_v17  ;;  %v3230_v46 = vrot.slane %v3229_v44, 2  ;;  %v3241_v40 = vsel %vm1025_vm2, %v1005_v8, -inf  ;;  %3998 = vmatprep.mubr.msk.f32.mxu0 %vm1025_vm2, %v1005_v8  ;;  %4048 = vmatprep.mubr.msk.f32.mxu1 %vm1025_vm2, %v1005_v8  ;;  %v59_v28 = vld [vmem:[%s5251_s2 + $0x10] sm:$0xff]  ;;  %s4199_s2 = smov 16  }
 0x111   :  { %v4618_v6 = vpop.f32.mrb[28].mxu0  ;;  %v3203_v24 = vmax.f32 %v3201_v41, %v3202_v7  ;;  %v3250_v36 = vmax.f32 %v3248_v58, %v3249_v53  ;;  %v3242_v14 = vrot.slane %v3241_v40, 4  ;;  %v1008_v30 = vmax.f32 %v976_v18, 0.0  ;;  %4078 = vmatprep.subr.mxu1 %v59_v28 }
 0x112   :  { %v4624_v19 = vpop.f32.mrb[29].mxu0  ;;  %v3219_v29 = vmax.f32 %v3217_v48, %v3218_v25  ;;  %3999 = vmatmul.mubr.msk.f32.gmra.mrb[50].mxu0 %vm1025_vm2, %v1006_v37  ;;  %4049 = vmatmul.mubr.msk.f32.gmra.mrb[18].mxu1 %vm1025_vm2, %v1006_v37  ;;  %v3231_v13 = vmax.f32 %v3229_v44, %v3230_v46  ;;  %v975_v31 = vadd.f32 %v860_v61, %v4579_v22  ;;  %v3239_v37 = vrot.slane %v3238_v11, 1 }
 0x113   :  { %v740_v41 = vrot.slane %v718_v15, %v4422_v51  ;;  %v3251_v48 = vrot.slane %v3250_v36, 2  ;;  %v3243_v60 = vmax.f32 %v3241_v40, %v3242_v14  ;;  %4079 = vmatpush3.msra.mxu1 %v59_v28  ;;  %v3262_v22 = vsel %vm1025_vm2, %v1008_v30, -inf }
 0x114   :  { %v4637_v7 = vsel %vm3413_vm3, %v3226_v62, %v3219_v29  ;;  %v3232_v46 = vrot.slane %v3231_v13, 1  ;;  %v1007_v44 = vmax.f32 %v975_v31, 0.0  ;;  %v3263_v53 = vrot.slane %v3262_v22, 4 }
 0x115   :  { %v4639_v17 = vpop.f32.mrb[30].mxu0  ;;  %v872_v58 = vrot.slane %v740_v41, %v4416_v47  ;;  %v4645_v15 = vmax.f32 %v3250_v36, %v3251_v48  ;;  %v3244_v25 = vrot.slane %v3243_v60, 2  ;;  %v3204_v18 = vrot.slane %v3203_v24, 1 }
 0x116   :  { %v4643_v8 = vpop.f32.mrb[31].mxu0  ;;  %v3191_v62 = vmax.f32 %v4561_v39, %v3190_v34  ;;  %v3255_v40 = vsel %vm1025_vm2, %v1007_v44, -inf  ;;  %v3210_v29 = vmax.f32 %v4586_v0, %v3209_v3  ;;  %4001 = vmatprep.mubr.msk.f32.mxu0 %vm1025_vm2, %v1007_v44  ;;  %4051 = vmatprep.mubr.msk.f32.mxu1 %vm1025_vm2, %v1007_v44  ;;  %v4657_v36 = vmax.f32 %v3238_v11, %v3239_v37 }
 0x117   :  { %v978_v61 = vadd.f32 %v4593_v5, %v872_v58  ;;  %v4659_v14 = vmax.f32 %v3243_v60, %v3244_v25  ;;  %v4661_v28 = vmax.f32 %v3262_v22, %v3263_v53  ;;  %v3256_v31 = vrot.slane %v3255_v40, 4  ;;  %4002 = vmatmul.mubr.msk.f32.gmra.mrb[52].mxu0 %vm1025_vm2, %v1008_v30  ;;  %4052 = vmatmul.mubr.msk.f32.gmra.mrb[20].mxu1 %vm1025_vm2, %v1008_v30 }
 0x118   :  { %v4667_v34 = vmax.f32 %v3231_v13, %v3232_v46  ;;  %v3211_v5 = vrot.slane %v3210_v29, 1  ;;  %v3557_v3 = vsel %vm3415_vm4, %v4556_v33, %v4535_v10  ;;  %v3253_v37 = vrot.slane %v4645_v15, 1 }
 0x119   :  { %v4665_v39 = vpop.f32.mrb[32].mxu0  ;;  %v1010_v0 = vmax.f32 %v978_v61, 0.0  ;;  %v3246_v48 = vrot.slane %v4659_v14, 1  ;;  %v3257_v60 = vmax.f32 %v3255_v40, %v3256_v31  ;;  %v3205_v22 = vmax.f32 %v3203_v24, %v3204_v18 }
 0x11a   :  { %v4672_v11 = vpop.f32.mrb[33].mxu0  ;;  %v3265_v30 = vrot.slane %v4661_v28, 2  ;;  %v3558_v13 = vsel %vm3417_vm5, %v4554_v32, %v3557_v3  ;;  %v726_v46 = vrot.slane %v4486_v50, %v4422_v51  ;;  %v3212_v33 = vmax.f32 %v3210_v29, %v3211_v5 }
 0x11b   :  { %v3276_v44 = vsel %vm1025_vm2, %v1010_v0, -inf  ;;  %v3258_v58 = vrot.slane %v3257_v60, 2  ;;  %v3559_v25 = vsel %vm3419_vm6, %v3191_v62, %v3558_v13  ;;  %v750_v40 = vcombine.high %v740_v41, %v740_v41 }
 0x11c   :  { %v3277_v10 = vrot.slane %v3276_v44, 4  ;;  %v3560_v24 = vsel %vm3421_vm7, %v4591_v35, %v3559_v25  ;;  %v868_v18 = vrot.slane %v726_v46, %v4416_v47  ;;  %v748_v61 = vcombine.high %v726_v46, %v726_v46 }
 0x11d   :  { %v4683_v53 = vpop.f32.mrb[34].mxu0  ;;  %v4690_v32 = vmax.f32 %v3257_v60, %v3258_v58  ;;  %v3561_v50 = vsel %vm3423_vm8, %v3205_v22, %v3560_v24  ;;  %v719_v29 = vcombine.high %v4530_v1, %v4530_v1  ;;  %v880_v35 = vrot.slane %v750_v40, %v4416_v47 }
 0x11e   :  { %v4688_v31 = vpop.f32.mrb[35].mxu0  ;;  %v3278_v3 = vmax.f32 %v3276_v44, %v3277_v10  ;;  %v3562_v62 = vsel %vm3425_vm9, %v3212_v33, %v3561_v50  ;;  %v977_v5 = vadd.f32 %v868_v18, %v4599_v27  ;;  %v876_v13 = vrot.slane %v748_v61, %v4416_v47 }
 0x11f   :  { %3584 = vrot.lane.b32.xlu0 %v3562_v62, %s4199_s2  ;;  %v747_v60 = vrot.slane %v719_v29, %v4422_v51  ;;  %v733_v22 = vrot.slane %v4530_v1, %v4422_v51  ;;  %v4707_v44 = vrot.slane %v767_v20, %v4422_v51  ;;  %v980_v58 = vadd.f32 %v4608_v26, %v880_v35 }
 0x120   :  { %v3279_v41 = vrot.slane %v3278_v3, 2  ;;  %v1009_v46 = vmax.f32 %v977_v5, 0.0  ;;  %v979_v10 = vadd.f32 %v876_v13, %v4611_v42  ;;  %v3260_v33 = vrot.slane %v4690_v32, 1 }
 0x121   :  { %v4709_v27 = vpop.f32.mrb[36].mxu0  ;;  %v888_v1 = vrot.slane %v747_v60, %v4416_v47  ;;  %v884_v18 = vrot.slane %v733_v22, %v4416_v47  ;;  %v751_v40 = vcombine.high %v747_v60, %v747_v60  ;;  %v1012_v61 = vmax.f32 %v980_v58, 0.0 }
 0x122   :  { %v4714_v25 = vpop.f32.mrb[37].mxu0  ;;  %v3280_v24 = vmax.f32 %v3278_v3, %v3279_v41  ;;  %v3269_v20 = vsel %vm1025_vm2, %v1009_v46, -inf  ;;  %v1011_v50 = vmax.f32 %v979_v10, 0.0  ;;  %4004 = vmatprep.mubr.msk.f32.mxu0 %vm1025_vm2, %v1009_v46  ;;  %4054 = vmatprep.mubr.msk.f32.mxu1 %vm1025_vm2, %v1009_v46  ;;  %v749_v26 = vcombine.high %v733_v22, %v733_v22 }
 0x123   :  { %v3270_v29 = vrot.slane %v3269_v20, 4  ;;  %4005 = vmatmul.mubr.msk.f32.gmra.mrb[54].mxu0 %vm1025_vm2, %v1010_v0  ;;  %4055 = vmatmul.mubr.msk.f32.gmra.mrb[22].mxu1 %vm1025_vm2, %v1010_v0  ;;  %v982_v3 = vadd.f32 %v4618_v6, %v888_v1  ;;  %v981_v62 = vadd.f32 %v884_v18, %v4624_v19  ;;  %v3290_v5 = vsel %vm1025_vm2, %v1012_v61, -inf }
 0x124   :  { %v3281_v42 = vrot.slane %v3280_v24, 1  ;;  %v3283_v35 = vsel %vm1025_vm2, %v1011_v50, -inf  ;;  %4007 = vmatprep.mubr.msk.f32.mxu0 %vm1025_vm2, %v1011_v50  ;;  %4057 = vmatprep.mubr.msk.f32.mxu1 %vm1025_vm2, %v1011_v50  ;;  %v896_v13 = vrot.slane %v751_v40, %v4416_v47  ;;  %v892_v41 = vrot.slane %v749_v26, %v4416_v47 }
 0x125   :  { %v3271_v22 = vmax.f32 %v3269_v20, %v3270_v29  ;;  %v3291_v46 = vrot.slane %v3290_v5, 4  ;;  %v3284_v0 = vrot.slane %v3283_v35, 4  ;;  %v1014_v58 = vmax.f32 %v982_v3, 0.0 }
 0x126   :  { %v3282_v60 = vmax.f32 %v3280_v24, %v3281_v42  ;;  %v1013_v6 = vmax.f32 %v981_v62, 0.0  ;;  %v984_v19 = vadd.f32 %v4639_v17, %v896_v13  ;;  %v983_v10 = vadd.f32 %v892_v41, %v4643_v8 }
 0x127   :  { %v3272_v1 = vrot.slane %v3271_v22, 2  ;;  %v3292_v18 = vmax.f32 %v3290_v5, %v3291_v46  ;;  %v3285_v56 = vmax.f32 %v3283_v35, %v3284_v0  ;;  %4008 = vmatmul.mubr.msk.f32.gmra.mrb[56].mxu0 %vm1025_vm2, %v1012_v61  ;;  %4058 = vmatmul.mubr.msk.f32.gmra.mrb[24].mxu1 %vm1025_vm2, %v1012_v61  ;;  %v904_v40 = vrot.slane %v4707_v44, %v4416_v47 }
 0x128   :  { %v3304_v24 = vsel %vm1025_vm2, %v1014_v58, -inf  ;;  %v3297_v20 = vsel %vm1025_vm2, %v1013_v6, -inf  ;;  %v1016_v50 = vmax.f32 %v984_v19, 0.0  ;;  %v1015_v26 = vmax.f32 %v983_v10, 0.0  ;;  %4010 = vmatprep.mubr.msk.f32.mxu0 %vm1025_vm2, %v1013_v6  ;;  %4060 = vmatprep.mubr.msk.f32.mxu1 %vm1025_vm2, %v1013_v6 }
 0x129   :  { %v3273_v17 = vmax.f32 %v3271_v22, %v3272_v1  ;;  %v3293_v8 = vrot.slane %v3292_v18, 2  ;;  %v3286_v42 = vrot.slane %v3285_v56, 2  ;;  %v3305_v29 = vrot.slane %v3304_v24, 4 }
 0x12a   :  { %v3298_v3 = vrot.slane %v3297_v20, 4  ;;  %v3318_v61 = vsel %vm1025_vm2, %v1016_v50, -inf  ;;  %v3311_v62 = vsel %vm1025_vm2, %v1015_v26, -inf  ;;  %v986_v5 = vadd.f32 %v4665_v39, %v904_v40 }
 0x12b   :  { %v3274_v35 = vrot.slane %v3273_v17, 1  ;;  %v3294_v13 = vmax.f32 %v3292_v18, %v3293_v8  ;;  %v3287_v41 = vmax.f32 %v3285_v56, %v3286_v42  ;;  %v3306_v46 = vmax.f32 %v3304_v24, %v3305_v29  ;;  %4011 = vmatmul.mubr.msk.f32.gmra.mrb[58].mxu0 %vm1025_vm2, %v1014_v58  ;;  %4061 = vmatmul.mubr.msk.f32.gmra.mrb[26].mxu1 %vm1025_vm2, %v1014_v58 }
 0x12c   :  { %v3299_v0 = vmax.f32 %v3297_v20, %v3298_v3  ;;  %v3319_v22 = vrot.slane %v3318_v61, 4  ;;  %v3312_v6 = vrot.slane %v3311_v62, 4  ;;  %v4746_v19 = vmax.f32 %v986_v5, 0.0  ;;  %4013 = vmatprep.mubr.msk.f32.mxu0 %vm1025_vm2, %v1015_v26  ;;  %4063 = vmatprep.mubr.msk.f32.mxu1 %vm1025_vm2, %v1015_v26 }
 0x12d   :  { %v3275_v10 = vmax.f32 %v3273_v17, %v3274_v35  ;;  %v3295_v1 = vrot.slane %v3294_v13, 1  ;;  %v3288_v39 = vrot.slane %v3287_v41, 1  ;;  %v3307_v40 = vrot.slane %v3306_v46, 2 }
 0x12e   :  { %v3300_v18 = vrot.slane %v3299_v0, 2  ;;  %v3320_v56 = vmax.f32 %v3318_v61, %v3319_v22  ;;  %v3313_v24 = vmax.f32 %v3311_v62, %v3312_v6  ;;  %v3332_v8 = vsel %vm1025_vm2, %v4746_v19, -inf }
 0x12f   :  { %v3254_v58 = vmax.f32 %v4645_v15, %v3253_v37  ;;  %v3247_v20 = vmax.f32 %v4659_v14, %v3246_v48  ;;  %v3570_v26 = vsel %vm3413_vm3, %v3282_v60, %v3275_v10  ;;  %v3308_v17 = vmax.f32 %v3306_v46, %v3307_v40  ;;  %4014 = vmatmul.mubr.msk.f32.gmra.mrb[60].mxu0 %vm1025_vm2, %v1016_v50 }
 0x130   :  { %v4760_v42 = vmax.f32 %v3294_v13, %v3295_v1  ;;  %v3301_v29 = vmax.f32 %v3299_v0, %v3300_v18  ;;  %v3314_v3 = vrot.slane %v3313_v24, 2  ;;  %v3333_v61 = vrot.slane %v3332_v8, 4  ;;  %4064 = vmatmul.mubr.msk.f32.gmra.mrb[28].mxu1 %vm1025_vm2, %v1016_v50 }
 0x131   :  { %v3289_v62 = vmax.f32 %v3287_v41, %v3288_v39  ;;  %v3261_v15 = vmax.f32 %v4690_v32, %v3260_v33  ;;  %v3266_v14 = vmax.f32 %v4661_v28, %v3265_v30  ;;  %v3564_v37 = vsel %vm3415_vm4, %v4667_v34, %v4637_v7 }
 0x132   :  { %v3309_v48 = vrot.slane %v3308_v17, 1  ;;  %v3321_v60 = vrot.slane %v3320_v56, 2  ;;  %v3334_v5 = vmax.f32 %v3332_v8, %v3333_v61  ;;  %v3565_v35 = vsel %vm3417_vm5, %v4657_v36, %v3564_v37 }
 0x133   :  { %v3315_v50 = vmax.f32 %v3313_v24, %v3314_v3  ;;  %v3267_v13 = vrot.slane %v3266_v14, 1  ;;  %v3566_v41 = vsel %vm3419_vm6, %v3247_v20, %v3565_v35  ;;  %v775_v32 = vrot.slane %v4489_v52, %v4422_v51 }
 0x134   :  { %v3302_v33 = vrot.slane %v3301_v29, 1  ;;  %v3335_v46 = vrot.slane %v3334_v5, 2  ;;  %v3567_v28 = vsel %vm3421_vm7, %v3254_v58, %v3566_v41  ;;  %v799_v7 = vcombine.high %v4707_v44, %v4707_v44 }
 0x135   :  { %v3268_v34 = vmax.f32 %v3266_v14, %v3267_v13  ;;  %v3568_v30 = vsel %vm3423_vm8, %v3261_v15, %v3567_v28  ;;  %v900_v0 = vrot.slane %v775_v32, %v4416_v47  ;;  %v797_v36 = vcombine.high %v775_v32, %v775_v32 }
 0x136   :  { %v3310_v22 = vmax.f32 %v3308_v17, %v3309_v48  ;;  %v912_v6 = vrot.slane %v799_v7, %v4416_v47  ;;  %v920_v10 = vrot.slane %v4482_v49, %v4416_v47  ;;  %v916_v52 = vrot.slane %v4473_v43, %v4416_v47 }
 0x137   :  { %v3569_v1 = vsel %vm3425_vm9, %v3268_v34, %v3568_v30  ;;  %v985_v39 = vadd.f32 %v900_v0, %v4672_v11  ;;  %v908_v44 = vrot.slane %v797_v36, %v4416_v47  ;;  %v3316_v40 = vrot.slane %v3315_v50, 1 }
 0x138   :  { %v3303_v18 = vmax.f32 %v3301_v29, %v3302_v33  ;;  %3586 = vrot.lane.b32.xlu1 %v3569_v1, %s4199_s2  ;;  %v988_v24 = vadd.f32 %v4683_v53, %v912_v6  ;;  %v990_v8 = vadd.f32 %v4709_v27, %v920_v10  ;;  %v989_v58 = vadd.f32 %v916_v52, %v4714_v25 }
 0x139   :  { %v3336_v49 = vmax.f32 %v3334_v5, %v3335_v46  ;;  %v1017_v20 = vmax.f32 %v985_v39, 0.0  ;;  %v987_v43 = vadd.f32 %v908_v44, %v4688_v31  ;;  %v3322_v17 = vmax.f32 %v3320_v56, %v3321_v60 }
 0x13a   :  { %v1020_v3 = vmax.f32 %v988_v24, 0.0  ;;  %v1022_v61 = vmax.f32 %v990_v8, 0.0  ;;  %v1021_v11 = vmax.f32 %v989_v58, 0.0  ;;  %v3317_v15 = vmax.f32 %v3315_v50, %v3316_v40 }
 0x13b   :  { %v3325_v14 = vsel %vm1025_vm2, %v1017_v20, -inf  ;;  %v1019_v29 = vmax.f32 %v987_v43, 0.0  ;;  %4016 = vmatprep.mubr.msk.f32.mxu0 %vm1025_vm2, %v1017_v20  ;;  %4066 = vmatprep.mubr.msk.f32.mxu1 %vm1025_vm2, %v1017_v20  ;;  %v3323_v53 = vrot.slane %v3322_v17, 1  ;;  %v3571_v27 = vsel %vm3415_vm4, %v3289_v62, %v3570_v26 }
 0x13c   :  { %v3326_v25 = vrot.slane %v3325_v14, 4  ;;  %v3346_v37 = vsel %vm1025_vm2, %v1020_v3, -inf  ;;  %4017 = vmatmul.mubr.msk.f32.gmra.mrb[62].mxu0 %vm1025_vm2, %v4746_v19  ;;  %4067 = vmatmul.mubr.msk.f32.gmra.mrb[30].mxu1 %vm1025_vm2, %v4746_v19  ;;  %v3360_v31 = vsel %vm1025_vm2, %v1022_v61, -inf  ;;  %v3353_v56 = vsel %vm1025_vm2, %v1021_v11, -inf }
 0x13d   :  { %v3347_v48 = vrot.slane %v3346_v37, 4  ;;  %v3339_v60 = vsel %vm1025_vm2, %v1019_v29, -inf  ;;  %v3361_v5 = vrot.slane %v3360_v31, 4  ;;  %v3354_v35 = vrot.slane %v3353_v56, 4  ;;  %4019 = vmatprep.mubr.msk.f32.mxu0 %vm1025_vm2, %v1019_v29  ;;  %4069 = vmatprep.mubr.msk.f32.mxu1 %vm1025_vm2, %v1019_v29 }
 0x13e   :  { %v3337_v26 = vrot.slane %v3336_v49, 1  ;;  %v3327_v62 = vmax.f32 %v3325_v14, %v3326_v25  ;;  %v3340_v50 = vrot.slane %v3339_v60, 4  ;;  %v3572_v13 = vsel %vm3417_vm5, %v4760_v42, %v3571_v27 }
 0x13f   :  { %v3348_v19 = vmax.f32 %v3346_v37, %v3347_v48  ;;  %v3362_v41 = vmax.f32 %v3360_v31, %v3361_v5  ;;  %v3355_v32 = vmax.f32 %v3353_v56, %v3354_v35  ;;  %v3573_v33 = vsel %vm3419_vm6, %v3303_v18, %v3572_v13 }
 0x140   :  { %v3328_v46 = vrot.slane %v3327_v62, 2  ;;  %v3341_v28 = vmax.f32 %v3339_v60, %v3340_v50  ;;  %4020 = vmatmul.mubr.msk.f32.gmra.mrb[64].mxu0 %vm1025_vm2, %v1020_v3  ;;  %4070 = vmatmul.mubr.msk.f32.gmra.mrb[32].mxu1 %vm1025_vm2, %v1020_v3  ;;  %v3324_v7 = vmax.f32 %v3322_v17, %v3323_v53  ;;  %v3574_v34 = vsel %vm3421_vm7, %v3310_v22, %v3573_v33 }
 0x141   :  { %v3349_v30 = vrot.slane %v3348_v19, 2  ;;  %v3363_v0 = vrot.slane %v3362_v41, 2  ;;  %v3356_v36 = vrot.slane %v3355_v32, 2  ;;  %4022 = vmatprep.mubr.msk.f32.mxu0 %vm1025_vm2, %v1021_v11  ;;  %4072 = vmatprep.mubr.msk.f32.mxu1 %vm1025_vm2, %v1021_v11  ;;  %v3575_v42 = vsel %vm3423_vm8, %v3317_v15, %v3574_v34 }
 0x142   :  { %v3329_v6 = vmax.f32 %v3327_v62, %v3328_v46  ;;  %v3342_v10 = vrot.slane %v3341_v28, 2  ;;  %v3576_v52 = vsel %vm3425_vm9, %v3324_v7, %v3575_v42  ;;  %v5255_v22 = vrot.slane %v4545_v23, 2 }
 0x143   :  { %v3350_v1 = vmax.f32 %v3348_v19, %v3349_v30  ;;  %v3364_v39 = vmax.f32 %v3362_v41, %v3363_v0  ;;  %v3357_v44 = vmax.f32 %v3355_v32, %v3356_v36  ;;  %3588 = vrot.lane.b32.xlu0 %v3576_v52, %s4199_s2  ;;  %v3338_v18 = vmax.f32 %v3336_v49, %v3337_v26 }
 0x144   :  { %v3371_v40 = vmax.f32 %v4545_v23, %v5255_v22  ;;  %v3330_v24 = vrot.slane %v3329_v6, 1  ;;  %v3343_v8 = vmax.f32 %v3341_v28, %v3342_v10  ;;  %4023 = vmatmul.mubr.msk.f32.gmra.mrb[66].mxu0 %vm1025_vm2, %v1022_v61  ;;  %4073 = vmatmul.mubr.msk.f32.gmra.mrb[34].mxu1 %vm1025_vm2, %v1022_v61  ;;  %v5256_v43 = vrot.slane %v4543_v21, 2 }
 0x145   :  { %v3351_v58 = vrot.slane %v3350_v1, 1  ;;  %v3358_v20 = vrot.slane %v3357_v44, 1  ;;  %4025 = vmatprep.mubr.msk.f32.mxu0 %vm1025_vm2, %v4516_v45  ;;  %4075 = vmatprep.mubr.msk.f32.mxu1 %vm1025_vm2, %v4516_v45  ;;  %v3365_v3 = vrot.slane %v3364_v39, 1  ;;  %v178_v10 = vadd.f32 %v4431_v59, %v4444_v9 }
 0x146   :  { %v3378_v17 = vmax.f32 %v4543_v21, %v5256_v43  ;;  %v3331_v23 = vmax.f32 %v3329_v6, %v3330_v24  ;;  %v3344_v49 = vrot.slane %v3343_v8, 1  ;;  %v3372_v61 = vrot.slane %v3371_v40, 1 }
 0x147   :  { %v3359_v14 = vmax.f32 %v3357_v44, %v3358_v20  ;;  %v3352_v29 = vmax.f32 %v3350_v1, %v3351_v58  ;;  %v3366_v27 = vmax.f32 %v3364_v39, %v3365_v3  ;;  %v1407_v43 = vrot.slane %v178_v10, %v4422_v51 }
 0x148   :  { %v3577_v11 = vsel %vm3413_vm3, %v3338_v18, %v3331_v23  ;;  %v3345_v15 = vmax.f32 %v3343_v8, %v3344_v49  ;;  %4026 = vmatmul.mubr.msk.f32.gmra.mrb[68].mxu0 %vm1025_vm2, %v4514_v38  ;;  %4076 = vmatmul.mubr.msk.f32.gmra.mrb[36].mxu1 %vm1025_vm2, %v4514_v38  ;;  %v3379_v45 = vrot.slane %v3378_v17, 1  ;;  %v3373_v25 = vmax.f32 %v3371_v40, %v3372_v61 }
 0x149   :  { %v172_v38 = vadd.f32 %v4424_v54, %v4444_v9 }
 0x14a   :  { %v3578_v53 = vsel %vm3415_vm4, %v3345_v15, %v3577_v11  ;;  %v3380_v31 = vmax.f32 %v3378_v17, %v3379_v45 }
 0x14b   :  { %v3579_v21 = vsel %vm3417_vm5, %v3352_v29, %v3578_v53  ;;  %v1358_v5 = vrot.slane %v172_v38, %v4422_v51  ;;  %v1351_v26 = vcombine.high %v172_v38, %v172_v38  ;;  %v1400_v29 = vcombine.high %v178_v10, %v178_v10 }
 0x14c   :  { %v3580_v37 = vsel %vm3419_vm6, %v3359_v14, %v3579_v21  ;;  %v1415_v38 = vcombine.high %v1407_v43, %v1407_v43 }
 0x14d   :  { %v3581_v56 = vsel %vm3421_vm7, %v3366_v27, %v3580_v37  ;;  %v1366_v35 = vcombine.high %v1358_v5, %v1358_v5  ;;  %v1374_v50 = vrot.slane %v1358_v5, %v4422_v51  ;;  %v1365_v13 = vrot.slane %v1351_v26, %v4422_v51 }
 0x14e   :  { %v3582_v48 = vsel %vm3423_vm8, %v3373_v25, %v3581_v56 }
 0x14f   :  { %v3583_v60 = vsel %vm3425_vm9, %v3380_v31, %v3582_v48  ;;  %v1388_v62 = vrot.slane %v1366_v35, %v4422_v51  ;;  %v1550_v33 = vrot.slane %v1374_v50, %v4416_v47  ;;  %v1396_v46 = vcombine.high %v1374_v50, %v1374_v50 }
 0x150   :  { %3590 = vrot.lane.b32.xlu1 %v3583_v60, %s4199_s2  ;;  %v1367_v54 = vcombine.high %v1365_v13, %v1365_v13  ;;  %v4863_v24 = vrot.slane %v1365_v13, %v4422_v51 }
 0x151   :  { %v1554_v19 = vrot.slane %v1388_v62, %v4416_v47  ;;  %v1398_v41 = vcombine.high %v1388_v62, %v1388_v62  ;;  %v1558_v6 = vrot.slane %v1396_v46, %v4416_v47  ;;  %v1414_v62 = vrot.slane %v1400_v29, %v4422_v51 }
 0x152   :  { %v4858_v44 = vrot.slane %v1367_v54, %v4422_v51  ;;  %v1566_v61 = vrot.slane %v4863_v24, %v4416_v47 }
 0x153   :  { %v1562_v0 = vrot.slane %v1398_v41, %v4416_v47 }
 0x154   :  { %v1570_v49 = vrot.slane %v4858_v44, %v4416_v47 }
 0x1c3   :  { %v3982_v32 = vpop.f32.mrb[38].mxu0 }
 0x1c4   :  { %v1708_v28 = vadd.f32 %v3982_v32, %v1554_v19  ;;  %v1188_v7 = vpop.f32.mrb[39].mxu0 }
 0x1c5   :  { %v1707_v34 = vadd.f32 %v1550_v33, %v1188_v7 }
 0x1c6   :  { %v1740_v30 = vmax.f32 %v1708_v28, 0.0  ;;  %v184_v28 = vadd.f32 %v4435_v2, %v4444_v9  ;;  %v1423_v9 = vrot.slane %v1407_v43, %v4422_v51 }
 0x1c7   :  { %v1739_v36 = vmax.f32 %v1707_v34, 0.0  ;;  %v3985_v42 = vpop.f32.mrb[40].mxu0 }
 0x1c8   :  { %v2940_v52 = vsel %vm1025_vm2, %v1740_v30, -inf  ;;  %v1710_v1 = vadd.f32 %v3985_v42, %v1562_v0  ;;  %v1198_v39 = vpop.f32.mrb[41].mxu0  ;;  %v1437_v42 = vrot.slane %v1415_v38, %v4422_v51  ;;  %v1430_v38 = vrot.slane %v1414_v62, %v4422_v51 }
 0x1c9   :  { %v2941_v22 = vrot.slane %v2940_v52, 4  ;;  %v2933_v40 = vsel %vm1025_vm2, %v1739_v36, -inf  ;;  %v1709_v18 = vadd.f32 %v1558_v6, %v1198_v39  ;;  %4080 = vmatprep.mubr.msk.f32.mxu1 %vm1025_vm2, %v1739_v36  ;;  %v1399_v36 = vcombine.high %v4858_v44, %v4858_v44 }
 0x1ca   :  { %v2934_v8 = vrot.slane %v2933_v40, 4  ;;  %v1742_v58 = vmax.f32 %v1710_v1, 0.0  ;;  %4081 = vmatmul.mubr.msk.f32.vlgmr.msra.gmra.mrb[6].mxu1 %vm1025_vm2, %v1740_v30  ;;  %v1397_v1 = vcombine.high %v4863_v24, %v4863_v24  ;;  %v1449_v39 = vcombine.high %v184_v28, %v184_v28 }
 0x1cb   :  { %v2942_v59 = vmax.f32 %v2940_v52, %v2941_v22  ;;  %v1741_v20 = vmax.f32 %v1709_v18, 0.0  ;;  %v3988_v14 = vpop.f32.mrb[42].mxu0  ;;  %v4890_v22 = vrot.slane %v184_v28, %v4422_v51 }
 0x1cc   :  { %v2935_v17 = vmax.f32 %v2933_v40, %v2934_v8  ;;  %v2954_v23 = vsel %vm1025_vm2, %v1742_v58, -inf  ;;  %v1712_v27 = vadd.f32 %v3988_v14, %v1570_v49  ;;  %v1208_v21 = vpop.f32.mrb[43].mxu0  ;;  %v1574_v24 = vrot.slane %v1397_v1, %v4416_v47 }
 0x1cd   :  { %v2943_v3 = vrot.slane %v2942_v59, 2  ;;  %v2955_v11 = vrot.slane %v2954_v23, 4  ;;  %v2947_v15 = vsel %vm1025_vm2, %v1741_v20, -inf  ;;  %4083 = vmatprep.mubr.msk.f32.mxu1 %vm1025_vm2, %v1741_v20  ;;  %v1711_v31 = vadd.f32 %v1566_v61, %v1208_v21 }
 0x1ce   :  { %v2936_v45 = vrot.slane %v2935_v17, 2  ;;  %v2948_v53 = vrot.slane %v2947_v15, 4  ;;  %4084 = vmatmul.mubr.msk.f32.gmra.mrb[8].mxu1 %vm1025_vm2, %v1742_v58  ;;  %v1744_v60 = vmax.f32 %v1712_v27, 0.0  ;;  %v1578_v58 = vrot.slane %v1399_v36, %v4416_v47 }
 0x1cf   :  { %v2944_v25 = vmax.f32 %v2942_v59, %v2943_v3  ;;  %v2956_v37 = vmax.f32 %v2954_v23, %v2955_v11  ;;  %v1743_v26 = vmax.f32 %v1711_v31, 0.0  ;;  %v1416_v59 = vcombine.high %v1414_v62, %v1414_v62 }
 0x1d0   :  { %v2937_v56 = vmax.f32 %v2935_v17, %v2936_v45  ;;  %v2949_v48 = vmax.f32 %v2947_v15, %v2948_v53  ;;  %v2968_v19 = vsel %vm1025_vm2, %v1744_v60, -inf  ;;  %v1447_v49 = vcombine.high %v1437_v42, %v1437_v42 }
 0x1d1   :  { %v2945_v5 = vrot.slane %v2944_v25, 1  ;;  %v2957_v35 = vrot.slane %v2956_v37, 2  ;;  %v2969_v33 = vrot.slane %v2968_v19, 4  ;;  %v2961_v46 = vsel %vm1025_vm2, %v1743_v26, -inf  ;;  %4086 = vmatprep.mubr.msk.f32.mxu1 %vm1025_vm2, %v1743_v26 }
 0x1d2   :  { %v2938_v50 = vrot.slane %v2937_v56, 1  ;;  %v2950_v13 = vrot.slane %v2949_v48, 2  ;;  %v2962_v34 = vrot.slane %v2961_v46, 4  ;;  %4087 = vmatmul.mubr.msk.f32.gmra.mrb[10].mxu1 %vm1025_vm2, %v1744_v60  ;;  %v1445_v15 = vcombine.high %v1423_v9, %v1423_v9 }
 0x1d3   :  { %v2946_v41 = vmax.f32 %v2944_v25, %v2945_v5  ;;  %v2958_v32 = vmax.f32 %v2956_v37, %v2957_v35  ;;  %v2970_v0 = vmax.f32 %v2968_v19, %v2969_v33  ;;  %v4897_v61 = vrot.slane %v1449_v39, %v4422_v51 }
 0x1d4   :  { %v2939_v7 = vmax.f32 %v2937_v56, %v2938_v50  ;;  %v2951_v54 = vmax.f32 %v2949_v48, %v2950_v13  ;;  %v2963_v52 = vmax.f32 %v2961_v46, %v2962_v34  ;;  %v1464_v29 = vcombine.high %v4890_v22, %v4890_v22 }
 0x1d5   :  { %v2959_v30 = vrot.slane %v2958_v32, 1  ;;  %v2971_v2 = vrot.slane %v2970_v0, 2  ;;  %v1586_v21 = vrot.slane %v1437_v42, %v4416_v47  ;;  %v1582_v25 = vrot.slane %v1423_v9, %v4416_v47 }
 0x1d6   :  { %v3484_v6 = vsel %vm3413_vm3, %v2946_v41, %v2939_v7  ;;  %v2952_v10 = vrot.slane %v2951_v54, 1  ;;  %v2964_v18 = vrot.slane %v2963_v52, 2  ;;  %v1444_v37 = vrot.slane %v1416_v59, %v4422_v51 }
 0x1d7   :  { %v2960_v8 = vmax.f32 %v2958_v32, %v2959_v30  ;;  %v2972_v44 = vmax.f32 %v2970_v0, %v2971_v2  ;;  %v1594_v60 = vrot.slane %v1447_v49, %v4416_v47  ;;  %v1590_v13 = vrot.slane %v1445_v15, %v4416_v47 }
 0x1d8   :  { %v2953_v40 = vmax.f32 %v2951_v54, %v2952_v10  ;;  %v2965_v17 = vmax.f32 %v2963_v52, %v2964_v18  ;;  %v1448_v62 = vcombine.high %v1444_v37, %v1444_v37  ;;  %v1602_v0 = vrot.slane %v1444_v37, %v4416_v47 }
 0x1d9   :  { %v3991_v23 = vpop.f32.mrb[44].mxu0  ;;  %v2973_v3 = vrot.slane %v2972_v44, 1  ;;  %v1446_v36 = vcombine.high %v1430_v38, %v1430_v38  ;;  %v1598_v1 = vrot.slane %v1430_v38, %v4416_v47 }
 0x1da   :  { %v3485_v20 = vsel %vm3415_vm4, %v2953_v40, %v3484_v6  ;;  %v1714_v43 = vadd.f32 %v3991_v23, %v1578_v58  ;;  %v1218_v11 = vpop.f32.mrb[45].mxu0  ;;  %v2966_v45 = vrot.slane %v2965_v17, 1  ;;  %v1610_v58 = vrot.slane %v1448_v62, %v4416_v47 }
 0x1db   :  { %v3486_v14 = vsel %vm3417_vm5, %v2960_v8, %v3485_v20  ;;  %v1713_v53 = vadd.f32 %v1574_v24, %v1218_v11  ;;  %v2974_v5 = vmax.f32 %v2972_v44, %v2973_v3  ;;  %v1606_v24 = vrot.slane %v1446_v36, %v4416_v47 }
 0x1dc   :  { %v1746_v27 = vmax.f32 %v1714_v43, 0.0  ;;  %v2967_v31 = vmax.f32 %v2965_v17, %v2966_v45 }
 0x1dd   :  { %v1745_v56 = vmax.f32 %v1713_v53, 0.0  ;;  %v3994_v48 = vpop.f32.mrb[46].mxu0 }
 0x1de   :  { %v2982_v35 = vsel %vm1025_vm2, %v1746_v27, -inf  ;;  %v1716_v26 = vadd.f32 %v3994_v48, %v1586_v21  ;;  %v1228_v50 = vpop.f32.mrb[47].mxu0  ;;  %v3487_v33 = vsel %vm3419_vm6, %v2967_v31, %v3486_v14 }
 0x1df   :  { %v2983_v19 = vrot.slane %v2982_v35, 4  ;;  %v2975_v41 = vsel %vm1025_vm2, %v1745_v56, -inf  ;;  %v1715_v32 = vadd.f32 %v1582_v25, %v1228_v50  ;;  %4089 = vmatprep.mubr.msk.f32.mxu1 %vm1025_vm2, %v1745_v56  ;;  %v3488_v7 = vsel %vm3421_vm7, %v2974_v5, %v3487_v33 }
 0x1e0   :  { %v2976_v46 = vrot.slane %v2975_v41, 4  ;;  %v1748_v28 = vmax.f32 %v1716_v26, 0.0  ;;  %4090 = vmatmul.mubr.msk.f32.gmra.mrb[12].mxu1 %vm1025_vm2, %v1746_v27 }
 0x1e1   :  { %v2984_v54 = vmax.f32 %v2982_v35, %v2983_v19  ;;  %v1747_v34 = vmax.f32 %v1715_v32, 0.0  ;;  %v3997_v30 = vpop.f32.mrb[48].mxu0 }
 0x1e2   :  { %v2977_v42 = vmax.f32 %v2975_v41, %v2976_v46  ;;  %v2996_v6 = vsel %vm1025_vm2, %v1748_v28, -inf  ;;  %v1718_v10 = vadd.f32 %v3997_v30, %v1594_v60  ;;  %v1238_v52 = vpop.f32.mrb[49].mxu0 }
 0x1e3   :  { %v2985_v2 = vrot.slane %v2984_v54, 2  ;;  %v2997_v9 = vrot.slane %v2996_v6, 4  ;;  %v2989_v39 = vsel %vm1025_vm2, %v1747_v34, -inf  ;;  %v1717_v40 = vadd.f32 %v1590_v13, %v1238_v52  ;;  %4092 = vmatprep.mubr.msk.f32.mxu1 %vm1025_vm2, %v1747_v34 }
 0x1e4   :  { %v2978_v18 = vrot.slane %v2977_v42, 2  ;;  %v2990_v8 = vrot.slane %v2989_v39, 4  ;;  %v1750_v44 = vmax.f32 %v1718_v10, 0.0  ;;  %4093 = vmatmul.mubr.msk.f32.gmra.mrb[14].mxu1 %vm1025_vm2, %v1748_v28 }
 0x1e5   :  { %v2986_v59 = vmax.f32 %v2984_v54, %v2985_v2  ;;  %v2998_v20 = vmax.f32 %v2996_v6, %v2997_v9  ;;  %v1749_v17 = vmax.f32 %v1717_v40, 0.0  ;;  %v4000_v23 = vpop.f32.mrb[50].mxu0 }
 0x1e6   :  { %v2979_v49 = vmax.f32 %v2977_v42, %v2978_v18  ;;  %v2991_v3 = vmax.f32 %v2989_v39, %v2990_v8  ;;  %v3010_v43 = vsel %vm1025_vm2, %v1750_v44, -inf  ;;  %v1720_v11 = vadd.f32 %v4000_v23, %v1602_v0  ;;  %v1248_v15 = vpop.f32.mrb[51].mxu0 }
 0x1e7   :  { %v2987_v14 = vrot.slane %v2986_v59, 1  ;;  %v2999_v45 = vrot.slane %v2998_v20, 2  ;;  %v3011_v53 = vrot.slane %v3010_v43, 4  ;;  %v3003_v27 = vsel %vm1025_vm2, %v1749_v17, -inf  ;;  %4095 = vmatprep.mubr.msk.f32.mxu1 %vm1025_vm2, %v1749_v17 }
 0x1e8   :  { %v2980_v21 = vrot.slane %v2979_v49, 1  ;;  %v2992_v25 = vrot.slane %v2991_v3, 2  ;;  %v3004_v37 = vrot.slane %v3003_v27, 4  ;;  %v1752_v31 = vmax.f32 %v1720_v11, 0.0  ;;  %4096 = vmatmul.mubr.msk.f32.gmra.mrb[16].mxu1 %vm1025_vm2, %v1750_v44 }
 0x1e9   :  { %v3000_v56 = vmax.f32 %v2998_v20, %v2999_v45  ;;  %v3012_v48 = vmax.f32 %v3010_v43, %v3011_v53  ;;  %v1719_v60 = vadd.f32 %v1598_v1, %v1248_v15  ;;  %v2988_v38 = vmax.f32 %v2986_v59, %v2987_v14 }
 0x1ea   :  { %v2981_v5 = vmax.f32 %v2979_v49, %v2980_v21  ;;  %v2993_v35 = vmax.f32 %v2991_v3, %v2992_v25  ;;  %v3005_v26 = vmax.f32 %v3003_v27, %v3004_v37  ;;  %v3024_v50 = vsel %vm1025_vm2, %v1752_v31, -inf  ;;  %v4003_v33 = vpop.f32.mrb[52].mxu0 }
 0x1eb   :  { %v3001_v13 = vrot.slane %v3000_v56, 1  ;;  %v3013_v19 = vrot.slane %v3012_v48, 2  ;;  %v3025_v41 = vrot.slane %v3024_v50, 4  ;;  %v1751_v32 = vmax.f32 %v1719_v60, 0.0  ;;  %v1258_v54 = vpop.f32.mrb[53].mxu0 }
 0x1ec   :  { %v2994_v46 = vrot.slane %v2993_v35, 1  ;;  %v3006_v28 = vrot.slane %v3005_v26, 2  ;;  %v1722_v62 = vadd.f32 %v4003_v33, %v1610_v58  ;;  %v3489_v34 = vsel %vm3423_vm8, %v2981_v5, %v3488_v7 }
 0x1ed   :  { %v3002_v30 = vmax.f32 %v3000_v56, %v3001_v13  ;;  %v3014_v0 = vmax.f32 %v3012_v48, %v3013_v19  ;;  %v3026_v36 = vmax.f32 %v3024_v50, %v3025_v41  ;;  %v3017_v42 = vsel %vm1025_vm2, %v1751_v32, -inf  ;;  %4098 = vmatprep.mubr.msk.f32.mxu1 %vm1025_vm2, %v1751_v32 }
 0x1ee   :  { %v2995_v6 = vmax.f32 %v2993_v35, %v2994_v46  ;;  %v3007_v10 = vmax.f32 %v3005_v26, %v3006_v28  ;;  %v3018_v52 = vrot.slane %v3017_v42, 4  ;;  %v1754_v1 = vmax.f32 %v1722_v62, 0.0  ;;  %4099 = vmatmul.mubr.msk.f32.gmra.mrb[18].mxu1 %vm1025_vm2, %v1752_v31 }
 0x1ef   :  { %v3015_v2 = vrot.slane %v3014_v0, 1  ;;  %v3027_v9 = vrot.slane %v3026_v36, 2  ;;  %v1721_v39 = vadd.f32 %v1606_v24, %v1258_v54  ;;  %v3490_v40 = vsel %vm3425_vm9, %v2988_v38, %v3489_v34 }
 0x1f0   :  { %v3491_v7 = vsel %vm3413_vm3, %v3002_v30, %v2995_v6  ;;  %v3008_v18 = vrot.slane %v3007_v10, 1  ;;  %v3019_v8 = vmax.f32 %v3017_v42, %v3018_v52  ;;  %v3038_v44 = vsel %vm1025_vm2, %v1754_v1, -inf  ;;  %3512 = vrot.lane.b32.xlu0 %v3490_v40, %s4200_s25 }
 0x1f1   :  { %v3028_v58 = vmax.f32 %v3026_v36, %v3027_v9  ;;  %v3039_v59 = vrot.slane %v3038_v44, 4  ;;  %v1753_v20 = vmax.f32 %v1721_v39, 0.0  ;;  %v1486_v17 = vrot.slane %v1464_v29, %v4422_v51 }
 0x1f2   :  { %v1498_v23 = vcombine.high %v4451_v16, %v4451_v16  ;;  %v3009_v24 = vmax.f32 %v3007_v10, %v3008_v18  ;;  %v3020_v49 = vrot.slane %v3019_v8, 2  ;;  %v1472_v3 = vrot.slane %v4890_v22, %v4422_v51 }
 0x1f3   :  { %v3016_v43 = vmax.f32 %v3014_v0, %v3015_v2  ;;  %v3040_v11 = vmax.f32 %v3038_v44, %v3039_v59  ;;  %v3031_v15 = vsel %vm1025_vm2, %v1753_v20, -inf  ;;  %4101 = vmatprep.mubr.msk.f32.mxu1 %vm1025_vm2, %v1753_v20  ;;  %v1465_v14 = vcombine.high %v4897_v61, %v4897_v61 }
 0x1f4   :  { %v4948_v29 = vrot.slane %v4451_v16, %v4422_v51  ;;  %v3492_v45 = vsel %vm3415_vm4, %v3009_v24, %v3491_v7  ;;  %v3021_v53 = vmax.f32 %v3019_v8, %v3020_v49  ;;  %v3032_v27 = vrot.slane %v3031_v15, 4  ;;  %4102 = vmatmul.mubr.msk.f32.gmra.mrb[20].mxu1 %vm1025_vm2, %v1754_v1 }
 0x1f5   :  { %v3029_v22 = vrot.slane %v3028_v58, 1  ;;  %v3041_v21 = vrot.slane %v3040_v11, 2  ;;  %v1496_v25 = vcombine.high %v1486_v17, %v1486_v17  ;;  %v3493_v37 = vsel %vm3417_vm5, %v3016_v43, %v3492_v45 }
 0x1f6   :  { %v3022_v31 = vrot.slane %v3021_v53, 1  ;;  %v3033_v56 = vmax.f32 %v3031_v15, %v3032_v27  ;;  %v1618_v48 = vrot.slane %v1486_v17, %v4416_v47  ;;  %v1494_v60 = vcombine.high %v1472_v3, %v1472_v3  ;;  %v4006_v5 = vpop.f32.mrb[54].mxu0 }
 0x1f7   :  { %v4955_v38 = vrot.slane %v1498_v23, %v4422_v51  ;;  %v3042_v16 = vmax.f32 %v3040_v11, %v3041_v21  ;;  %v1614_v35 = vrot.slane %v1472_v3, %v4416_v47  ;;  %v1493_v26 = vrot.slane %v1465_v14, %v4422_v51  ;;  %v1268_v41 = vpop.f32.mrb[55].mxu0 }
 0x1f8   :  { %v3023_v50 = vmax.f32 %v3021_v53, %v3022_v31  ;;  %v3034_v13 = vrot.slane %v3033_v56, 2  ;;  %v1724_v19 = vadd.f32 %v4006_v5, %v1618_v48  ;;  %v1479_v32 = vrot.slane %v4897_v61, %v4422_v51 }
 0x1f9   :  { %v1513_v33 = vcombine.high %v4948_v29, %v4948_v29  ;;  %v3030_v46 = vmax.f32 %v3028_v58, %v3029_v22  ;;  %v1723_v28 = vadd.f32 %v1614_v35, %v1268_v41  ;;  %v1626_v62 = vrot.slane %v1496_v25, %v4416_v47 }
 0x1fa   :  { %v3035_v54 = vmax.f32 %v3033_v56, %v3034_v13  ;;  %v1756_v34 = vmax.f32 %v1724_v19, 0.0  ;;  %v1622_v30 = vrot.slane %v1494_v60, %v4416_v47  ;;  %v3494_v0 = vsel %vm3419_vm6, %v3023_v50, %v3493_v37  ;;  %v4009_v6 = vpop.f32.mrb[56].mxu0 }
 0x1fb   :  { %v3043_v36 = vrot.slane %v3042_v16, 1  ;;  %v1755_v42 = vmax.f32 %v1723_v28, 0.0  ;;  %v1497_v10 = vcombine.high %v1493_v26, %v1493_v26  ;;  %v3495_v52 = vsel %vm3421_vm7, %v3030_v46, %v3494_v0  ;;  %v1278_v9 = vpop.f32.mrb[57].mxu0 }
 0x1fc   :  { %v3036_v61 = vrot.slane %v3035_v54, 1  ;;  %v3052_v1 = vsel %vm1025_vm2, %v1756_v34, -inf  ;;  %v1726_v2 = vadd.f32 %v4009_v6, %v1626_v62  ;;  %v1630_v39 = vrot.slane %v1479_v32, %v4416_v47 }
 0x1fd   :  { %v3053_v40 = vrot.slane %v3052_v1, 4  ;;  %v3045_v7 = vsel %vm1025_vm2, %v1755_v42, -inf  ;;  %v1725_v18 = vadd.f32 %v1622_v30, %v1278_v9  ;;  %4104 = vmatprep.mubr.msk.f32.mxu1 %vm1025_vm2, %v1755_v42  ;;  %v1495_v8 = vcombine.high %v1479_v32, %v1479_v32 }
 0x1fe   :  { %v3037_v44 = vmax.f32 %v3035_v54, %v3036_v61  ;;  %v3046_v58 = vrot.slane %v3045_v7, 4  ;;  %v1758_v59 = vmax.f32 %v1726_v2, 0.0  ;;  %4105 = vmatmul.mubr.msk.f32.gmra.mrb[22].mxu1 %vm1025_vm2, %v1756_v34  ;;  %v1634_v20 = vrot.slane %v1493_v26, %v4416_v47  ;;  %v4012_v24 = vpop.f32.mrb[58].mxu0 }
 0x1ff   :  { %v3054_v17 = vmax.f32 %v3052_v1, %v3053_v40  ;;  %v1757_v23 = vmax.f32 %v1725_v18, 0.0  ;;  %v1642_v49 = vrot.slane %v1497_v10, %v4416_v47  ;;  %v3044_v3 = vmax.f32 %v3042_v16, %v3043_v36  ;;  %v1288_v14 = vpop.f32.mrb[59].mxu0 }
 0x200   :  { %v3047_v43 = vmax.f32 %v3045_v7, %v3046_v58  ;;  %v3066_v11 = vsel %vm1025_vm2, %v1758_v59, -inf  ;;  %v1728_v15 = vadd.f32 %v4012_v24, %v1634_v20  ;;  %v3496_v45 = vsel %vm3423_vm8, %v3037_v44, %v3495_v52  ;;  %v4170_v52 = vld [vmem:[%s5250_s1 + $0x10] sm:$0xff] }
 0x201   :  { %v3055_v53 = vrot.slane %v3054_v17, 2  ;;  %v3067_v27 = vrot.slane %v3066_v11, 4  ;;  %v3059_v22 = vsel %vm1025_vm2, %v1757_v23, -inf  ;;  %v1727_v21 = vadd.f32 %v1630_v39, %v1288_v14  ;;  %4107 = vmatprep.mubr.msk.f32.mxu1 %vm1025_vm2, %v1757_v23 }
 0x202   :  { %v3048_v25 = vrot.slane %v3047_v43, 2  ;;  %v3060_v37 = vrot.slane %v3059_v22, 4  ;;  %v1760_v31 = vmax.f32 %v1728_v15, 0.0  ;;  %4108 = vmatmul.mubr.msk.f32.gmra.mrb[24].mxu1 %vm1025_vm2, %v1758_v59  ;;  %v3497_v56 = vsel %vm3425_vm9, %v3044_v3, %v3496_v45  ;;  %v4015_v5 = vpop.f32.mrb[60].mxu0 }
 0x203   :  { %v3056_v48 = vmax.f32 %v3054_v17, %v3055_v53  ;;  %v3068_v60 = vmax.f32 %v3066_v11, %v3067_v27  ;;  %v1759_v16 = vmax.f32 %v1727_v21, 0.0  ;;  %v1638_v35 = vrot.slane %v1495_v8, %v4416_v47  ;;  %3514 = vrot.lane.b32.xlu0 %v3497_v56, %s4200_s25  ;;  %v1298_v41 = vpop.f32.mrb[61].mxu0 }
 0x204   :  { %v3049_v26 = vmax.f32 %v3047_v43, %v3048_v25  ;;  %v3061_v50 = vmax.f32 %v3059_v22, %v3060_v37  ;;  %v3080_v13 = vsel %vm1025_vm2, %v1760_v31, -inf  ;;  %v1730_v19 = vadd.f32 %v4015_v5, %v1642_v49 }
 0x205   :  { %v3057_v32 = vrot.slane %v3056_v48, 1  ;;  %v3069_v46 = vrot.slane %v3068_v60, 2  ;;  %v3081_v28 = vrot.slane %v3080_v13, 4  ;;  %v3073_v62 = vsel %vm1025_vm2, %v1759_v16, -inf  ;;  %4110 = vmatprep.mubr.msk.f32.mxu1 %vm1025_vm2, %v1759_v16 }
 0x206   :  { %v3050_v54 = vrot.slane %v3049_v26, 1  ;;  %v3062_v34 = vrot.slane %v3061_v50, 2  ;;  %v3074_v30 = vrot.slane %v3073_v62, 4  ;;  %v1762_v0 = vmax.f32 %v1730_v19, 0.0  ;;  %4111 = vmatmul.mubr.msk.f32.gmra.mrb[26].mxu1 %vm1025_vm2, %v1760_v31 }
 0x207   :  { %v3058_v36 = vmax.f32 %v3056_v48, %v3057_v32  ;;  %v3070_v42 = vmax.f32 %v3068_v60, %v3069_v46  ;;  %v3082_v6 = vmax.f32 %v3080_v13, %v3081_v28  ;;  %v1729_v10 = vadd.f32 %v1638_v35, %v1298_v41  ;;  %3600 = vrot.lane.b32.xlu0 %v4170_v52, %s4197_s22 }
 0x208   :  { %v3051_v61 = vmax.f32 %v3049_v26, %v3050_v54  ;;  %v3063_v1 = vmax.f32 %v3061_v50, %v3062_v34  ;;  %v3075_v2 = vmax.f32 %v3073_v62, %v3074_v30  ;;  %v3094_v9 = vsel %vm1025_vm2, %v1762_v0, -inf }
 0x209   :  { %v3071_v39 = vrot.slane %v3070_v42, 1  ;;  %v3083_v40 = vrot.slane %v3082_v6, 2  ;;  %v3095_v7 = vrot.slane %v3094_v9, 4  ;;  %v1761_v18 = vmax.f32 %v1729_v10, 0.0 }
 0x20a   :  { %v3498_v8 = vsel %vm3413_vm3, %v3058_v36, %v3051_v61  ;;  %v3064_v44 = vrot.slane %v3063_v1, 1  ;;  %v3076_v58 = vrot.slane %v3075_v2, 2  ;;  %v1535_v23 = vrot.slane %v1513_v33, %v4422_v51 }
 0x20b   :  { %v3084_v59 = vmax.f32 %v3082_v6, %v3083_v40  ;;  %v3096_v20 = vmax.f32 %v3094_v9, %v3095_v7  ;;  %v3087_v17 = vsel %vm1025_vm2, %v1761_v18, -inf  ;;  %4113 = vmatprep.mubr.msk.f32.mxu1 %vm1025_vm2, %v1761_v18  ;;  %v1521_v43 = vrot.slane %v4948_v29, %v4422_v51 }
 0x20c   :  { %v3065_v24 = vmax.f32 %v3063_v1, %v3064_v44  ;;  %v3077_v49 = vmax.f32 %v3075_v2, %v3076_v58  ;;  %v3088_v3 = vrot.slane %v3087_v17, 4  ;;  %4114 = vmatmul.mubr.msk.f32.gmra.mrb[28].mxu1 %vm1025_vm2, %v1762_v0  ;;  %v3072_v11 = vmax.f32 %v3070_v42, %v3071_v39 }
 0x20d   :  { %v3085_v15 = vrot.slane %v3084_v59, 1  ;;  %v3097_v14 = vrot.slane %v3096_v20, 2  ;;  %v1514_v45 = vcombine.high %v4955_v38, %v4955_v38  ;;  %v1650_v21 = vrot.slane %v1535_v23, %v4416_v47 }
 0x20e   :  { %v3499_v53 = vsel %vm3415_vm4, %v3065_v24, %v3498_v8  ;;  %v3078_v27 = vrot.slane %v3077_v49, 1  ;;  %v3089_v33 = vmax.f32 %v3087_v17, %v3088_v3  ;;  %v1545_v25 = vcombine.high %v1535_v23, %v1535_v23 }
 0x20f   :  { %v3098_v22 = vmax.f32 %v3096_v20, %v3097_v14  ;;  %v3500_v37 = vsel %vm3417_vm5, %v3072_v11, %v3499_v53  ;;  %v4018_v56 = vpop.f32.mrb[62].mxu0  ;;  %v1646_v48 = vrot.slane %v1521_v43, %v4416_v47  ;;  %v1543_v60 = vcombine.high %v1521_v43, %v1521_v43 }
 0x210   :  { %v3079_v31 = vmax.f32 %v3077_v49, %v3078_v27  ;;  %v3090_v29 = vrot.slane %v3089_v33, 2  ;;  %v3086_v16 = vmax.f32 %v3084_v59, %v3085_v15  ;;  %v1732_v5 = vadd.f32 %v4018_v56, %v1650_v21  ;;  %v1308_v35 = vpop.f32.mrb[63].mxu0 }
 0x211   :  { %v1542_v26 = vrot.slane %v1514_v45, %v4422_v51  ;;  %v1528_v50 = vrot.slane %v4955_v38, %v4422_v51  ;;  %v1731_v19 = vadd.f32 %v1646_v48, %v1308_v35  ;;  %v3099_v32 = vrot.slane %v3098_v22, 1 }
 0x212   :  { %v3091_v13 = vmax.f32 %v3089_v33, %v3090_v29  ;;  %v3501_v41 = vsel %vm3419_vm6, %v3079_v31, %v3500_v37  ;;  %v1764_v46 = vmax.f32 %v1732_v5, 0.0  ;;  %v1658_v28 = vrot.slane %v1545_v25, %v4416_v47 }
 0x213   :  { %v3502_v62 = vsel %vm3421_vm7, %v3086_v16, %v3501_v41  ;;  %v1763_v34 = vmax.f32 %v1731_v19, 0.0  ;;  %v4021_v30 = vpop.f32.mrb[64].mxu0  ;;  %v1654_v0 = vrot.slane %v1543_v60, %v4416_v47  ;;  %v1666_v38 = vrot.slane %v1542_v26, %v4416_v47 }
 0x214   :  { %v3092_v54 = vrot.slane %v3091_v13, 1  ;;  %v3108_v36 = vsel %vm1025_vm2, %v1764_v46, -inf  ;;  %v1734_v42 = vadd.f32 %v4021_v30, %v1658_v28  ;;  %v1318_v6 = vpop.f32.mrb[65].mxu0  ;;  %v1662_v10 = vrot.slane %v1528_v50, %v4416_v47 }
 0x215   :  { %v3109_v61 = vrot.slane %v3108_v36, 4  ;;  %v3101_v1 = vsel %vm1025_vm2, %v1763_v34, -inf  ;;  %v1733_v2 = vadd.f32 %v1654_v0, %v1318_v6  ;;  %4116 = vmatprep.mubr.msk.f32.mxu1 %vm1025_vm2, %v1763_v34  ;;  %v1546_v40 = vcombine.high %v1542_v26, %v1542_v26 }
 0x216   :  { %v3093_v52 = vmax.f32 %v3091_v13, %v3092_v54  ;;  %v3102_v9 = vrot.slane %v3101_v1, 4  ;;  %v1766_v39 = vmax.f32 %v1734_v42, 0.0  ;;  %4117 = vmatmul.mubr.msk.f32.gmra.mrb[30].mxu1 %vm1025_vm2, %v1764_v46  ;;  %v3100_v7 = vmax.f32 %v3098_v22, %v3099_v32 }
 0x217   :  { %v3110_v18 = vmax.f32 %v3108_v36, %v3109_v61  ;;  %v1765_v8 = vmax.f32 %v1733_v2, 0.0  ;;  %v4024_v44 = vpop.f32.mrb[66].mxu0  ;;  %v1544_v58 = vcombine.high %v1528_v50, %v1528_v50  ;;  %v1674_v27 = vrot.slane %v1546_v40, %v4416_v47 }
 0x218   :  { %v3503_v59 = vsel %vm3423_vm8, %v3093_v52, %v3502_v62  ;;  %v3103_v20 = vmax.f32 %v3101_v1, %v3102_v9  ;;  %v3122_v17 = vsel %vm1025_vm2, %v1766_v39, -inf  ;;  %v1736_v23 = vadd.f32 %v4024_v44, %v1666_v38  ;;  %v1328_v24 = vpop.f32.mrb[67].mxu0 }
 0x219   :  { %v3504_v49 = vsel %vm3425_vm9, %v3100_v7, %v3503_v59  ;;  %v3111_v3 = vrot.slane %v3110_v18, 2  ;;  %v3123_v43 = vrot.slane %v3122_v17, 4  ;;  %v3115_v11 = vsel %vm1025_vm2, %v1765_v8, -inf  ;;  %4119 = vmatprep.mubr.msk.f32.mxu1 %vm1025_vm2, %v1765_v8 }
 0x21a   :  { %v1735_v15 = vadd.f32 %v1662_v10, %v1328_v24  ;;  %3516 = vrot.lane.b32.xlu1 %v3504_v49, %s4200_s25  ;;  %v3104_v14 = vrot.slane %v3103_v20, 2  ;;  %v3116_v45 = vrot.slane %v3115_v11, 4  ;;  %v1768_v53 = vmax.f32 %v1736_v23, 0.0  ;;  %4120 = vmatmul.mubr.msk.f32.gmra.mrb[32].mxu1 %vm1025_vm2, %v1766_v39 }
 0x21b   :  { %v3112_v33 = vmax.f32 %v3110_v18, %v3111_v3  ;;  %v3124_v22 = vmax.f32 %v3122_v17, %v3123_v43  ;;  %v4027_v25 = vpop.f32.mrb[68].mxu0  ;;  %v1670_v37 = vrot.slane %v1544_v58, %v4416_v47 }
 0x21c   :  { %v1767_v21 = vmax.f32 %v1735_v15, 0.0  ;;  %v3105_v31 = vmax.f32 %v3103_v20, %v3104_v14  ;;  %v3117_v29 = vmax.f32 %v3115_v11, %v3116_v45  ;;  %v3136_v56 = vsel %vm1025_vm2, %v1768_v53, -inf  ;;  %v1338_v60 = vpop.f32.mrb[69].mxu0 }
 0x21d   :  { %v1738_v48 = vadd.f32 %v4027_v25, %v1674_v27  ;;  %v3113_v16 = vrot.slane %v3112_v33, 1  ;;  %v3125_v5 = vrot.slane %v3124_v22, 2  ;;  %v3137_v35 = vrot.slane %v3136_v56, 4 }
 0x21e   :  { %v3129_v26 = vsel %vm1025_vm2, %v1767_v21, -inf  ;;  %4122 = vmatprep.mubr.msk.f32.mxu1 %vm1025_vm2, %v1767_v21  ;;  %v3106_v50 = vrot.slane %v3105_v31, 1  ;;  %v3118_v13 = vrot.slane %v3117_v29, 2  ;;  %v1737_v62 = vadd.f32 %v1670_v37, %v1338_v60  ;;  %v4171_v21 = vld [vmem:[%s5250_s1 + $0x18] sm:$0xff]  ;;  %s4201_s1 = smov [#allocation2]  }
 0x21f   :  { %v3130_v19 = vrot.slane %v3129_v26, 4  ;;  %v1770_v41 = vmax.f32 %v1738_v48, 0.0  ;;  %4123 = vmatmul.mubr.msk.f32.gmra.mrb[34].mxu1 %vm1025_vm2, %v1768_v53  ;;  %v3114_v32 = vmax.f32 %v3112_v33, %v3113_v16  ;;  %v3126_v46 = vmax.f32 %v3124_v22, %v3125_v5  ;;  %s3632_s29 = sshll.u32 %s4201_s1, 4  ;;  %s3633_s29 = int_to_ptr.vmem [resolvable:$true] %s3632_s29 }
 0x220   :  { %v3138_v28 = vmax.f32 %v3136_v56, %v3137_v35  ;;  %v3107_v54 = vmax.f32 %v3105_v31, %v3106_v50  ;;  %v3119_v34 = vmax.f32 %v3117_v29, %v3118_v13  ;;  %v1769_v38 = vmax.f32 %v1737_v62, 0.0  ;;  %s4172_s30 = scalar_lea.vmem %s3633_s29, 512  ;;  %p4177_p1 = scmp.lt.s32.totalorder %s3633_s29, %s3633_s29 }
 0x221   :  { %v3131_v30 = vmax.f32 %v3129_v26, %v3130_v19  ;;  %v3150_v0 = vsel %vm1025_vm2, %v1770_v41, -inf  ;;  %v3127_v36 = vrot.slane %v3126_v46, 1  ;;  %v259_v25 = vadd.f32 %v4429_v57, %v4437_v4  ;;  %p4173_p0 = scmp.ne.s32.totalorder %s3633_s29, %s4172_s30  ;;  %p4178_p2 = scmp.lt.s32.totalorder %s4172_s30, %s4172_s30 }
 0x222   :  { %v3139_v42 = vrot.slane %v3138_v28, 2  ;;  %v3151_v6 = vrot.slane %v3150_v0, 4  ;;  %v3505_v10 = vsel %vm3413_vm3, %v3114_v32, %v3107_v54  ;;  %v3120_v52 = vrot.slane %v3119_v34, 1  ;;  %4125 = vmatprep.mubr.msk.f32.mxu1 %vm1025_vm2, %v1769_v38 }
 0x223   :  { %v3132_v61 = vrot.slane %v3131_v30, 2  ;;  %v3143_v9 = vsel %vm1025_vm2, %v1769_v38, -inf  ;;  %4126 = vmatmul.mubr.msk.f32.gmra.mrb[36].mxu1 %vm1025_vm2, %v1770_v41  ;;  %v3128_v18 = vmax.f32 %v3126_v46, %v3127_v36  ;;  %v2328_v37 = vrot.slane %v259_v25, %v4422_v51  ;;  %p4179_p3 = por %p4178_p2, %p4177_p1 }
 0x224   :  { %v3140_v1 = vmax.f32 %v3138_v28, %v3139_v42  ;;  %v3152_v2 = vmax.f32 %v3150_v0, %v3151_v6  ;;  %v3121_v39 = vmax.f32 %v3119_v34, %v3120_v52  ;;  %v3144_v7 = vrot.slane %v3143_v9, 4 }
 0x225   :  { %v3133_v40 = vmax.f32 %v3131_v30, %v3132_v61  ;;  %v2336_v31 = vcombine.high %v2328_v37, %v2328_v37  ;;  %v2321_v29 = vcombine.high %v259_v25, %v259_v25  ;;  %v2344_v48 = vrot.slane %v2328_v37, %v4422_v51  ;;  %p4180_p4 = pnand %p4179_p3, %p4173_p0 }
 0x226   :  { %v3141_v8 = vrot.slane %v3140_v1, 1  ;;  %v3153_v44 = vrot.slane %v3152_v2, 2  ;;  %v3506_v58 = vsel %vm3415_vm4, %v3121_v39, %v3505_v10  ;;  %v3145_v20 = vmax.f32 %v3143_v9, %v3144_v7 }
 0x227   :  { %v3134_v59 = vrot.slane %v3133_v40, 1  ;;  %v3507_v23 = vsel %vm3417_vm5, %v3128_v18, %v3506_v58  ;;  %v2358_v56 = vrot.slane %v2336_v31, %v4422_v51  ;;  %v2335_v60 = vrot.slane %v2321_v29, %v4422_v51 }
 0x228   :  { %v3154_v17 = vmax.f32 %v3152_v2, %v3153_v44  ;;  %v3146_v49 = vrot.slane %v3145_v20, 2  ;;  %v3142_v3 = vmax.f32 %v3140_v1, %v3141_v8  ;;  %v2520_v26 = vrot.slane %v2344_v48, %v4416_v47 }
 0x229   :  { %v3135_v24 = vmax.f32 %v3133_v40, %v3134_v59  ;;  %v2524_v16 = vrot.slane %v2358_v56, %v4416_v47  ;;  %v2368_v5 = vcombine.high %v2358_v56, %v2358_v56  ;;  %v2366_v50 = vcombine.high %v2344_v48, %v2344_v48 }
 0x22a   :  { %v3147_v43 = vmax.f32 %v3145_v20, %v3146_v49  ;;  %v3155_v15 = vrot.slane %v3154_v17, 1  ;;  %v2337_v57 = vcombine.high %v2335_v60, %v2335_v60  ;;  %v2351_v10 = vrot.slane %v2335_v60, %v4422_v51 }
 0x22b   :  { %v3508_v11 = vsel %vm3419_vm6, %v3135_v24, %v3507_v23  ;;  %v2532_v46 = vrot.slane %v2368_v5, %v4416_v47  ;;  %v2528_v34 = vrot.slane %v2366_v50, %v4416_v47  ;;  %v264_v1 = vadd.f32 %v4426_v55, %v4437_v4 }
 0x22c   :  { %v3509_v14 = vsel %vm3421_vm7, %v3142_v3, %v3508_v11  ;;  %v3148_v45 = vrot.slane %v3147_v43, 1  ;;  %v3156_v27 = vmax.f32 %v3154_v17, %v3155_v15  ;;  %v2365_v42 = vrot.slane %v2337_v57, %v4422_v51 }
 0x22d   :  { %v2536_v59 = vrot.slane %v2351_v10, %v4416_v47  ;;  %v2377_v49 = vrot.slane %v264_v1, %v4422_v51  ;;  %v2370_v11 = vcombine.high %v264_v1, %v264_v1  ;;  %v5076_v57 = vadd.f32 %v4433_v63, %v4437_v4 }
 0x22e   :  { %v3149_v53 = vmax.f32 %v3147_v43, %v3148_v45  ;;  %v2540_v18 = vrot.slane %v2365_v42, %v4416_v47 }
 0x22f   :  { %v2385_v31 = vcombine.high %v2377_v49, %v2377_v49  ;;  %v2384_v5 = vrot.slane %v2370_v11, %v4422_v51  ;;  %v2419_v4 = vcombine.high %v5076_v57, %v5076_v57 }
 0x230   :  { %v3510_v33 = vsel %vm3423_vm8, %v3149_v53, %v3509_v14 }
 0x231   :  { %v3511_v22 = vsel %vm3425_vm9, %v3156_v27, %v3510_v33 }
 0x232   :  { %3518 = vrot.lane.b32.xlu1 %v3511_v22, %s4200_s25 }
 0x236   :  { %3602 = vrot.lane.b32.xlu1 %v4171_v21, %s4197_s22 }
 0x29d   :  { %v4082_v35 = vpop.f32.mrb[6].mxu1 }
 0x29e   :  { %v2678_v13 = vadd.f32 %v4082_v35, %v2524_v16  ;;  %v2158_v19 = vpop.f32.mrb[7].mxu1 }
 0x29f   :  { %v2677_v41 = vadd.f32 %v2520_v26, %v2158_v19  ;;  %v2369_v26 = vcombine.high %v2365_v42, %v2365_v42  ;;  %v2367_v19 = vcombine.high %v2351_v10, %v2351_v10 }
 0x2a0   :  { %v2716_v32 = vsel %vm1025_vm2, %v2678_v13, -inf }
 0x2a1   :  { %v2717_v28 = vrot.slane %v2716_v32, 4  ;;  %v2709_v62 = vsel %vm1025_vm2, %v2677_v41, -inf  ;;  %v4085_v54 = vpop.f32.mrb[8].mxu1  ;;  %v2544_v63 = vrot.slane %v2367_v19, %v4416_v47 }
 0x2a2   :  { %v2710_v30 = vrot.slane %v2709_v62, 4  ;;  %v2680_v0 = vadd.f32 %v4085_v54, %v2532_v46  ;;  %v2168_v36 = vpop.f32.mrb[9].mxu1  ;;  %v2407_v46 = vrot.slane %v2385_v31, %v4422_v51  ;;  %v2393_v54 = vrot.slane %v2377_v49, %v4422_v51 }
 0x2a3   :  { %v2718_v6 = vmax.f32 %v2716_v32, %v2717_v28  ;;  %v2679_v38 = vadd.f32 %v2528_v34, %v2168_v36  ;;  %v2386_v36 = vcombine.high %v2384_v5, %v2384_v5 }
 0x2a4   :  { %v2711_v52 = vmax.f32 %v2709_v62, %v2710_v30  ;;  %v2730_v61 = vsel %vm1025_vm2, %v2680_v0, -inf  ;;  %v2548_v0 = vrot.slane %v2369_v26, %v4416_v47 }
 0x2a5   :  { %v2719_v2 = vrot.slane %v2718_v6, 2  ;;  %v2731_v9 = vrot.slane %v2730_v61, 4  ;;  %v2723_v39 = vsel %vm1025_vm2, %v2679_v38, -inf  ;;  %v4088_v58 = vpop.f32.mrb[10].mxu1  ;;  %v5088_v38 = vrot.slane %v5076_v57, %v4422_v51 }
 0x2a6   :  { %v2712_v40 = vrot.slane %v2711_v52, 2  ;;  %v2724_v7 = vrot.slane %v2723_v39, 4  ;;  %v2682_v23 = vadd.f32 %v4088_v58, %v2540_v18  ;;  %v2178_v24 = vpop.f32.mrb[11].mxu1  ;;  %v2415_v18 = vcombine.high %v2393_v54, %v2393_v54 }
 0x2a7   :  { %v2720_v8 = vmax.f32 %v2718_v6, %v2719_v2  ;;  %v2732_v44 = vmax.f32 %v2730_v61, %v2731_v9  ;;  %v2681_v43 = vadd.f32 %v2536_v59, %v2178_v24  ;;  %v2556_v61 = vrot.slane %v2407_v46, %v4416_v47 }
 0x2a8   :  { %v2713_v20 = vmax.f32 %v2711_v52, %v2712_v40  ;;  %v2725_v17 = vmax.f32 %v2723_v39, %v2724_v7  ;;  %v2744_v45 = vsel %vm1025_vm2, %v2682_v23, -inf  ;;  %v2417_v9 = vcombine.high %v2407_v46, %v2407_v46 }
 0x2a9   :  { %v2721_v55 = vrot.slane %v2720_v8, 1  ;;  %v2733_v3 = vrot.slane %v2732_v44, 2  ;;  %v2745_v33 = vrot.slane %v2744_v45, 4  ;;  %v2737_v22 = vsel %vm1025_vm2, %v2681_v43, -inf }
 0x2aa   :  { %v2714_v15 = vrot.slane %v2713_v20, 1  ;;  %v2726_v14 = vrot.slane %v2725_v17, 2  ;;  %v2738_v37 = vrot.slane %v2737_v22, 4  ;;  %v5092_v39 = vrot.slane %v2384_v5, %v4422_v51 }
 0x2ab   :  { %v2722_v53 = vmax.f32 %v2720_v8, %v2721_v55  ;;  %v2734_v27 = vmax.f32 %v2732_v44, %v2733_v3  ;;  %v2746_v56 = vmax.f32 %v2744_v45, %v2745_v33  ;;  %v2414_v8 = vrot.slane %v2386_v36, %v4422_v51  ;;  %v5096_v44 = vpop.permute.xlu0 %3596 }
 0x2ac   :  { %v2715_v21 = vmax.f32 %v2713_v20, %v2714_v15  ;;  %v2727_v25 = vmax.f32 %v2725_v17, %v2726_v14  ;;  %v2739_v16 = vmax.f32 %v2737_v22, %v2738_v37  ;;  %v2552_v23 = vrot.slane %v2393_v54, %v4416_v47 }
 0x2ad   :  { %v2735_v29 = vrot.slane %v2734_v27, 1  ;;  %v2747_v35 = vrot.slane %v2746_v56, 2  ;;  %v2434_v24 = vcombine.high %v5088_v38, %v5088_v38  ;;  %v2564_v14 = vrot.slane %v2417_v9, %v4416_v47 }
 0x2ae   :  { %v3414_v48 = vsel %vm3413_vm3, %v2722_v53, %v2715_v21  ;;  %v2728_v60 = vrot.slane %v2727_v25, 1  ;;  %v2740_v13 = vrot.slane %v2739_v16, 2  ;;  %v2416_v45 = vcombine.high %v5092_v39, %v5092_v39 }
 0x2af   :  { %v2736_v41 = vmax.f32 %v2734_v27, %v2735_v29  ;;  %v2748_v32 = vmax.f32 %v2746_v56, %v2747_v35  ;;  %v2560_v33 = vrot.slane %v2415_v18, %v4416_v47  ;;  %v2418_v22 = vcombine.high %v2414_v8, %v2414_v8  ;;  %v3585_v35 = vpop.permute.xlu0 %3584 }
 0x2b0   :  { %v2729_v50 = vmax.f32 %v2727_v25, %v2728_v60  ;;  %v2741_v62 = vmax.f32 %v2739_v16, %v2740_v13  ;;  %v2568_v29 = vrot.slane %v5092_v39, %v4416_v47  ;;  %v2572_v5 = vrot.slane %v2414_v8, %v4416_v47 }
 0x2b1   :  { %v2749_v34 = vrot.slane %v2748_v32, 1  ;;  %v2576_v19 = vrot.slane %v2416_v45, %v4416_v47  ;;  %v2456_v57 = vrot.slane %v2434_v24, %v4422_v51 }
 0x2b2   :  { %v3416_v28 = vsel %vm3415_vm4, %v2729_v50, %v3414_v48  ;;  %v2742_v42 = vrot.slane %v2741_v62, 1 }
 0x2b3   :  { %v3418_v30 = vsel %vm3417_vm5, %v2736_v41, %v3416_v28  ;;  %v4091_v6 = vpop.f32.mrb[12].mxu1  ;;  %v2750_v40 = vmax.f32 %v2748_v32, %v2749_v34  ;;  %v2580_v28 = vrot.slane %v2418_v22, %v4416_v47 }
 0x2b4   :  { %v2684_v10 = vadd.f32 %v4091_v6, %v2548_v0  ;;  %v2188_v52 = vpop.f32.mrb[13].mxu1  ;;  %v2743_v1 = vmax.f32 %v2741_v62, %v2742_v42  ;;  %v5117_v6 = vpop.permute.xlu0 %3588 }
 0x2b5   :  { %v2683_v2 = vadd.f32 %v2544_v63, %v2188_v52 }
 0x2b6   :  { %v2758_v7 = vsel %vm1025_vm2, %v2684_v10, -inf  ;;  %v3420_v58 = vsel %vm3419_vm6, %v2743_v1, %v3418_v30 }
 0x2b7   :  { %v2759_v59 = vrot.slane %v2758_v7, 4  ;;  %v2751_v20 = vsel %vm1025_vm2, %v2683_v2, -inf  ;;  %v4094_v17 = vpop.f32.mrb[14].mxu1  ;;  %v3422_v55 = vsel %vm3421_vm7, %v2750_v40, %v3420_v58 }
 0x2b8   :  { %v2752_v49 = vrot.slane %v2751_v20, 4  ;;  %v2686_v3 = vadd.f32 %v4094_v17, %v2556_v61  ;;  %v2198_v43 = vpop.f32.mrb[15].mxu1 }
 0x2b9   :  { %v2760_v11 = vmax.f32 %v2758_v7, %v2759_v59  ;;  %v2685_v15 = vadd.f32 %v2552_v23, %v2198_v43  ;;  %v3513_v23 = vpop.permute.xlu0 %3512 }
 0x2ba   :  { %v2753_v53 = vmax.f32 %v2751_v20, %v2752_v49  ;;  %v2772_v27 = vsel %vm1025_vm2, %v2686_v3, -inf }
 0x2bb   :  { %v2761_v21 = vrot.slane %v2760_v11, 2  ;;  %v2773_v25 = vrot.slane %v2772_v27, 4  ;;  %v2765_v37 = vsel %vm1025_vm2, %v2685_v15, -inf  ;;  %v4097_v31 = vpop.f32.mrb[16].mxu1 }
 0x2bc   :  { %v2754_v56 = vrot.slane %v2753_v53, 2  ;;  %v2766_v48 = vrot.slane %v2765_v37, 4  ;;  %v2688_v60 = vadd.f32 %v4097_v31, %v2564_v14  ;;  %v2208_v16 = vpop.f32.mrb[17].mxu1 }
 0x2bd   :  { %v2762_v26 = vmax.f32 %v2760_v11, %v2761_v21  ;;  %v2774_v50 = vmax.f32 %v2772_v27, %v2773_v25  ;;  %v2687_v13 = vadd.f32 %v2560_v33, %v2208_v16 }
 0x2be   :  { %v2755_v41 = vmax.f32 %v2753_v53, %v2754_v56  ;;  %v2767_v32 = vmax.f32 %v2765_v37, %v2766_v48  ;;  %v2786_v46 = vsel %vm1025_vm2, %v2688_v60, -inf  ;;  %v2433_v48 = vrot.slane %v2419_v4, %v4422_v51 }
 0x2bf   :  { %v2763_v62 = vrot.slane %v2762_v26, 1  ;;  %v2775_v54 = vrot.slane %v2774_v50, 2  ;;  %v2787_v34 = vrot.slane %v2786_v46, 4  ;;  %v2779_v30 = vsel %vm1025_vm2, %v2687_v13, -inf }
 0x2c0   :  { %v2756_v0 = vrot.slane %v2755_v41, 1  ;;  %v2768_v36 = vrot.slane %v2767_v32, 2  ;;  %v2780_v42 = vrot.slane %v2779_v30, 4  ;;  %v2442_v4 = vrot.slane %v5088_v38, %v4422_v51 }
 0x2c1   :  { %v2776_v63 = vmax.f32 %v2774_v50, %v2775_v54  ;;  %v2788_v10 = vmax.f32 %v2786_v46, %v2787_v34  ;;  %v4100_v52 = vpop.f32.mrb[18].mxu1  ;;  %v2764_v40 = vmax.f32 %v2762_v26, %v2763_v62  ;;  %v2435_v34 = vcombine.high %v2433_v48, %v2433_v48 }
 0x2c2   :  { %v2757_v61 = vmax.f32 %v2755_v41, %v2756_v0  ;;  %v2769_v1 = vmax.f32 %v2767_v32, %v2768_v36  ;;  %v2781_v2 = vmax.f32 %v2779_v30, %v2780_v42  ;;  %v2690_v9 = vadd.f32 %v4100_v52, %v2572_v5  ;;  %v2218_v39 = vpop.f32.mrb[19].mxu1 }
 0x2c3   :  { %v2777_v7 = vrot.slane %v2776_v63, 1  ;;  %v2789_v18 = vrot.slane %v2788_v10, 2  ;;  %v2689_v8 = vadd.f32 %v2568_v29, %v2218_v39  ;;  %v2468_v36 = vcombine.high %v4448_v12, %v4448_v12 }
 0x2c4   :  { %v3424_v58 = vsel %vm3423_vm8, %v2757_v61, %v3422_v55  ;;  %v2770_v59 = vrot.slane %v2769_v1, 1  ;;  %v2782_v20 = vrot.slane %v2781_v2, 2  ;;  %v2800_v17 = vsel %vm1025_vm2, %v2690_v9, -inf }
 0x2c5   :  { %v3426_v49 = vsel %vm3425_vm9, %v2764_v40, %v3424_v58  ;;  %v2778_v3 = vmax.f32 %v2776_v63, %v2777_v7  ;;  %v2790_v43 = vmax.f32 %v2788_v10, %v2789_v18  ;;  %v2801_v11 = vrot.slane %v2800_v17, 4 }
 0x2c6   :  { %v2771_v15 = vmax.f32 %v2769_v1, %v2770_v59  ;;  %v2783_v14 = vmax.f32 %v2781_v2, %v2782_v20  ;;  %v2793_v45 = vsel %vm1025_vm2, %v2689_v8, -inf  ;;  %v3608_v53 = vsel %vm1025_vm2, %v3426_v49, %v3513_v23 }
 0x2c7   :  { %v2791_v27 = vrot.slane %v2790_v43, 1  ;;  %v2802_v33 = vmax.f32 %v2800_v17, %v2801_v11  ;;  %v2794_v22 = vrot.slane %v2793_v45, 4  ;;  %v4103_v55 = vpop.f32.mrb[20].mxu1  ;;  %v3613_v21 = vsel %vm3612_vm10, %v3608_v53, %v3585_v35 }
 0x2c8   :  { %v3427_v25 = vsel %vm3413_vm3, %v2778_v3, %v2771_v15  ;;  %v2784_v37 = vrot.slane %v2783_v14, 1  ;;  %v2692_v31 = vadd.f32 %v4103_v55, %v2580_v28  ;;  %v2228_v29 = vpop.f32.mrb[21].mxu1  ;;  %v3618_v56 = vsel %vm3617_vm11, %v3613_v21, %v5096_v44  ;;  %v3599_v3 = vpop.permute.xlu1 %3598 }
 0x2c9   :  { %v2803_v60 = vrot.slane %v2802_v33, 2  ;;  %v2795_v16 = vmax.f32 %v2793_v45, %v2794_v22  ;;  %v2691_v5 = vadd.f32 %v2576_v19, %v2228_v29  ;;  %3623 = vst.msk [vmem:[#allocation2] sm:$0xff] %vm3622_vm12, %v3618_v56  ;;  %v2792_v26 = vmax.f32 %v2790_v43, %v2791_v27 }
 0x2ca   :  { %v2785_v35 = vmax.f32 %v2783_v14, %v2784_v37  ;;  %v2814_v50 = vsel %vm1025_vm2, %v2692_v31, -inf  ;;  %v5147_v42 = vrot.slane %v4448_v12, %v4422_v51  ;;  %v2588_v52 = vrot.slane %v2456_v57, %v4416_v47 }
 0x2cb   :  { %v2804_v13 = vmax.f32 %v2802_v33, %v2803_v60  ;;  %v2796_v41 = vrot.slane %v2795_v16, 2  ;;  %v2815_v32 = vrot.slane %v2814_v50, 4  ;;  %v2807_v46 = vsel %vm1025_vm2, %v2691_v5, -inf }
 0x2cc   :  { %v3428_v44 = vsel %vm3415_vm4, %v2785_v35, %v3427_v25  ;;  %v2808_v28 = vrot.slane %v2807_v46, 4  ;;  %v2584_v38 = vrot.slane %v2442_v4, %v4416_v47  ;;  %v2466_v61 = vcombine.high %v2456_v57, %v2456_v57 }
 0x2cd   :  { %v2797_v19 = vmax.f32 %v2795_v16, %v2796_v41  ;;  %v3429_v62 = vsel %vm3417_vm5, %v2792_v26, %v3428_v44  ;;  %v2816_v54 = vmax.f32 %v2814_v50, %v2815_v32  ;;  %v2805_v30 = vrot.slane %v2804_v13, 1  ;;  %v3515_v50 = vpop.permute.xlu0 %3514 }
 0x2ce   :  { %v2809_v0 = vmax.f32 %v2807_v46, %v2808_v28  ;;  %v2464_v39 = vcombine.high %v2442_v4, %v2442_v4  ;;  %v2463_v40 = vrot.slane %v2435_v34, %v4422_v51  ;;  %v2449_v59 = vrot.slane %v2433_v48, %v4422_v51  ;;  %v3587_v28 = vpop.permute.xlu1 %3586 }
 0x2cf   :  { %v2798_v63 = vrot.slane %v2797_v19, 1  ;;  %v2817_v10 = vrot.slane %v2816_v54, 2  ;;  %v2806_v7 = vmax.f32 %v2804_v13, %v2805_v30  ;;  %v2483_v20 = vcombine.high %v5147_v42, %v5147_v42 }
 0x2d0   :  { %v2810_v24 = vrot.slane %v2809_v0, 2  ;;  %v2596_v14 = vrot.slane %v2466_v61, %v4416_v47  ;;  %v2592_v33 = vrot.slane %v2464_v39, %v4416_v47  ;;  %v2604_v22 = vrot.slane %v2463_v40, %v4416_v47 }
 0x2d1   :  { %v2799_v1 = vmax.f32 %v2797_v19, %v2798_v63  ;;  %v2818_v2 = vmax.f32 %v2816_v54, %v2817_v10  ;;  %v4106_v9 = vpop.f32.mrb[22].mxu1  ;;  %v2600_v31 = vrot.slane %v2449_v59, %v4416_v47  ;;  %v2467_v60 = vcombine.high %v2463_v40, %v2463_v40 }
 0x2d2   :  { %v2811_v18 = vmax.f32 %v2809_v0, %v2810_v24  ;;  %v2694_v8 = vadd.f32 %v4106_v9, %v2588_v52  ;;  %v2238_v58 = vpop.f32.mrb[23].mxu1  ;;  %v2465_v35 = vcombine.high %v2449_v59, %v2449_v59 }
 0x2d3   :  { %v3430_v17 = vsel %vm3419_vm6, %v2799_v1, %v3429_v62  ;;  %v2819_v23 = vrot.slane %v2818_v2, 1  ;;  %v2693_v49 = vadd.f32 %v2584_v38, %v2238_v58 }
 0x2d4   :  { %v2812_v43 = vrot.slane %v2811_v18, 1  ;;  %v3431_v11 = vsel %vm3421_vm7, %v2806_v7, %v3430_v17  ;;  %v2828_v15 = vsel %vm1025_vm2, %v2694_v8, -inf }
 0x2d5   :  { %v2829_v45 = vrot.slane %v2828_v15, 4  ;;  %v2821_v53 = vsel %vm1025_vm2, %v2693_v49, -inf  ;;  %v4109_v27 = vpop.f32.mrb[24].mxu1  ;;  %v2820_v29 = vmax.f32 %v2818_v2, %v2819_v23  ;;  %v2608_v23 = vrot.slane %v2465_v35, %v4416_v47 }
 0x2d6   :  { %v2813_v55 = vmax.f32 %v2811_v18, %v2812_v43  ;;  %v2822_v21 = vrot.slane %v2821_v53, 4  ;;  %v2696_v25 = vadd.f32 %v4109_v27, %v2596_v14  ;;  %v2248_v37 = vpop.f32.mrb[25].mxu1  ;;  %v2612_v18 = vrot.slane %v2467_v60, %v4416_v47 }
 0x2d7   :  { %v2830_v56 = vmax.f32 %v2828_v15, %v2829_v45  ;;  %v2695_v48 = vadd.f32 %v2592_v33, %v2248_v37  ;;  %v2505_v60 = vrot.slane %v2483_v20, %v4422_v51  ;;  %v2491_v35 = vrot.slane %v5147_v42, %v4422_v51 }
 0x2d8   :  { %v3432_v16 = vsel %vm3423_vm8, %v2813_v55, %v3431_v11  ;;  %v2823_v5 = vmax.f32 %v2821_v53, %v2822_v21  ;;  %v2842_v26 = vsel %vm1025_vm2, %v2696_v25, -inf  ;;  %v2482_v21 = vrot.slane %v2468_v36, %v4422_v51 }
 0x2d9   :  { %v3433_v13 = vsel %vm3425_vm9, %v2820_v29, %v3432_v16  ;;  %v2831_v41 = vrot.slane %v2830_v56, 2  ;;  %v2843_v32 = vrot.slane %v2842_v26, 4  ;;  %v2835_v46 = vsel %vm1025_vm2, %v2695_v48, -inf  ;;  %v4112_v44 = vpop.f32.mrb[26].mxu1 }
 0x2da   :  { %v2824_v57 = vrot.slane %v2823_v5, 2  ;;  %v2836_v4 = vrot.slane %v2835_v46, 4  ;;  %v2698_v19 = vadd.f32 %v4112_v44, %v2604_v22  ;;  %v2258_v62 = vpop.f32.mrb[27].mxu1  ;;  %v3609_v54 = vsel %vm1025_vm2, %v3433_v13, %v3515_v50 }
 0x2db   :  { %v2832_v34 = vmax.f32 %v2830_v56, %v2831_v41  ;;  %v2844_v30 = vmax.f32 %v2842_v26, %v2843_v32  ;;  %v2697_v0 = vadd.f32 %v2600_v31, %v2258_v62  ;;  %v3614_v63 = vsel %vm3612_vm10, %v3609_v54, %v3587_v28 }
 0x2dc   :  { %v2825_v10 = vmax.f32 %v2823_v5, %v2824_v57  ;;  %v2837_v24 = vmax.f32 %v2835_v46, %v2836_v4  ;;  %v2856_v52 = vsel %vm1025_vm2, %v2698_v19, -inf  ;;  %v3619_v38 = vsel %vm3617_vm11, %v3614_v63, %v3599_v3 }
 0x2dd   :  { %v2833_v61 = vrot.slane %v2832_v34, 1  ;;  %v2845_v1 = vrot.slane %v2844_v30, 2  ;;  %v2857_v2 = vrot.slane %v2856_v52, 4  ;;  %v2849_v9 = vsel %vm1025_vm2, %v2697_v0, -inf  ;;  %3624 = vst.msk [vmem:[#allocation2 + $0x8] sm:$0xff] %vm3622_vm12, %v3619_v38 }
 0x2de   :  { %v2826_v39 = vrot.slane %v2825_v10, 1  ;;  %v2838_v40 = vrot.slane %v2837_v24, 2  ;;  %v2850_v7 = vrot.slane %v2849_v9, 4  ;;  %v2620_v44 = vrot.slane %v2505_v60, %v4416_v47 }
 0x2df   :  { %v2834_v8 = vmax.f32 %v2832_v34, %v2833_v61  ;;  %v2846_v58 = vmax.f32 %v2844_v30, %v2845_v1  ;;  %v2858_v59 = vmax.f32 %v2856_v52, %v2857_v2  ;;  %v4115_v17 = vpop.f32.mrb[28].mxu1  ;;  %v2484_v28 = vcombine.high %v2482_v21, %v2482_v21  ;;  %v5198_v1 = vpop.permute.xlu1 %3590 }
 0x2e0   :  { %v2827_v49 = vmax.f32 %v2825_v10, %v2826_v39  ;;  %v2839_v3 = vmax.f32 %v2837_v24, %v2838_v40  ;;  %v2851_v43 = vmax.f32 %v2849_v9, %v2850_v7  ;;  %v2700_v11 = vadd.f32 %v4115_v17, %v2612_v18  ;;  %v2268_v15 = vpop.f32.mrb[29].mxu1 }
 0x2e1   :  { %v2847_v14 = vrot.slane %v2846_v58, 1  ;;  %v2859_v45 = vrot.slane %v2858_v59, 2  ;;  %v2699_v53 = vadd.f32 %v2608_v23, %v2268_v15  ;;  %v2515_v4 = vcombine.high %v2505_v60, %v2505_v60 }
 0x2e2   :  { %v3434_v27 = vsel %vm3413_vm3, %v2834_v8, %v2827_v49  ;;  %v2840_v33 = vrot.slane %v2839_v3, 1  ;;  %v2852_v22 = vrot.slane %v2851_v43, 2  ;;  %v2870_v55 = vsel %vm1025_vm2, %v2700_v11, -inf }
 0x2e3   :  { %v2860_v25 = vmax.f32 %v2858_v59, %v2859_v45  ;;  %v2871_v37 = vrot.slane %v2870_v55, 4  ;;  %v2863_v31 = vsel %vm1025_vm2, %v2699_v53, -inf  ;;  %v2848_v16 = vmax.f32 %v2846_v58, %v2847_v14  ;;  %v3517_v14 = vpop.permute.xlu1 %3516 }
 0x2e4   :  { %v2841_v29 = vmax.f32 %v2839_v3, %v2840_v33  ;;  %v2853_v56 = vmax.f32 %v2851_v43, %v2852_v22  ;;  %v2864_v48 = vrot.slane %v2863_v31, 4  ;;  %v2513_v19 = vcombine.high %v2491_v35, %v2491_v35  ;;  %v3601_v33 = vpop.permute.xlu0 %3600 }
 0x2e5   :  { %v2861_v5 = vrot.slane %v2860_v25, 1  ;;  %v2872_v26 = vmax.f32 %v2870_v55, %v2871_v37  ;;  %v2616_v34 = vrot.slane %v2491_v35, %v4416_v47  ;;  %v5194_v30 = vrot.slane %v2482_v21, %v4422_v51 }
 0x2e6   :  { %v3435_v12 = vsel %vm3415_vm4, %v2841_v29, %v3434_v27  ;;  %v2854_v36 = vrot.slane %v2853_v56, 1  ;;  %v2865_v50 = vmax.f32 %v2863_v31, %v2864_v48  ;;  %v2512_v61 = vrot.slane %v2484_v28, %v4422_v51 }
 0x2e7   :  { %v3436_v13 = vsel %vm3417_vm5, %v2848_v16, %v3435_v12  ;;  %v2873_v41 = vrot.slane %v2872_v26, 2  ;;  %v2862_v57 = vmax.f32 %v2860_v25, %v2861_v5  ;;  %v2628_v9 = vrot.slane %v2515_v4, %v4416_v47 }
 0x2e8   :  { %v2855_v32 = vmax.f32 %v2853_v56, %v2854_v36  ;;  %v2866_v46 = vrot.slane %v2865_v50, 2  ;;  %v2624_v39 = vrot.slane %v2513_v19, %v4416_v47  ;;  %v2632_v58 = vrot.slane %v5194_v30, %v4416_v47 }
 0x2e9   :  { %v2874_v20 = vmax.f32 %v2872_v26, %v2873_v41  ;;  %v4118_v42 = vpop.f32.mrb[30].mxu1  ;;  %v2514_v49 = vcombine.high %v5194_v30, %v5194_v30  ;;  %v2636_v11 = vrot.slane %v2512_v61, %v4416_v47  ;;  %v2516_v27 = vcombine.high %v2512_v61, %v2512_v61 }
 0x2ea   :  { %v3437_v62 = vsel %vm3419_vm6, %v2855_v32, %v3436_v13  ;;  %v2867_v54 = vmax.f32 %v2865_v50, %v2866_v46  ;;  %v2702_v63 = vadd.f32 %v4118_v42, %v2620_v44  ;;  %v2278_v10 = vpop.f32.mrb[31].mxu1 }
 0x2eb   :  { %v2875_v0 = vrot.slane %v2874_v20, 1  ;;  %v3438_v24 = vsel %vm3421_vm7, %v2862_v57, %v3437_v62  ;;  %v2701_v38 = vadd.f32 %v2616_v34, %v2278_v10  ;;  %v2640_v42 = vrot.slane %v2514_v49, %v4416_v47 }
 0x2ec   :  { %v2868_v52 = vrot.slane %v2867_v54, 1  ;;  %v2884_v2 = vsel %vm1025_vm2, %v2702_v63, -inf }
 0x2ed   :  { %v2885_v7 = vrot.slane %v2884_v2, 4  ;;  %v2877_v18 = vsel %vm1025_vm2, %v2701_v38, -inf  ;;  %v4121_v8 = vpop.f32.mrb[32].mxu1  ;;  %v2876_v59 = vmax.f32 %v2874_v20, %v2875_v0 }
 0x2ee   :  { %v2869_v40 = vmax.f32 %v2867_v54, %v2868_v52  ;;  %v2878_v17 = vrot.slane %v2877_v18, 4  ;;  %v2704_v23 = vadd.f32 %v4121_v8, %v2628_v9  ;;  %v2288_v51 = vpop.f32.mrb[33].mxu1 }
 0x2ef   :  { %v2886_v3 = vmax.f32 %v2884_v2, %v2885_v7  ;;  %v2703_v43 = vadd.f32 %v2624_v39, %v2288_v51 }
 0x2f0   :  { %v3439_v15 = vsel %vm3423_vm8, %v2869_v40, %v3438_v24  ;;  %v2879_v45 = vmax.f32 %v2877_v18, %v2878_v17  ;;  %v2898_v53 = vsel %vm1025_vm2, %v2704_v23, -inf }
 0x2f1   :  { %v3440_v22 = vsel %vm3425_vm9, %v2876_v59, %v3439_v15  ;;  %v2887_v55 = vrot.slane %v2886_v3, 2  ;;  %v2899_v21 = vrot.slane %v2898_v53, 4  ;;  %v2891_v25 = vsel %vm1025_vm2, %v2703_v43, -inf }
 0x2f2   :  { %v4124_v37 = vpop.f32.mrb[34].mxu1  ;;  %v3610_v31 = vsel %vm1025_vm2, %v3440_v22, %v3517_v14  ;;  %v2880_v29 = vrot.slane %v2879_v45, 2  ;;  %v2892_v56 = vrot.slane %v2891_v25, 4 }
 0x2f3   :  { %v2706_v48 = vadd.f32 %v4124_v37, %v2636_v11  ;;  %v2298_v60 = vpop.f32.mrb[35].mxu1  ;;  %v3615_v16 = vsel %vm3612_vm10, %v3610_v31, %v5117_v6  ;;  %v2888_v5 = vmax.f32 %v2886_v3, %v2887_v55  ;;  %v2900_v26 = vmax.f32 %v2898_v53, %v2899_v21 }
 0x2f4   :  { %v2705_v35 = vadd.f32 %v2632_v58, %v2298_v60  ;;  %v3620_v12 = vsel %vm3617_vm11, %v3615_v16, %v3601_v33  ;;  %v2881_v36 = vmax.f32 %v2879_v45, %v2880_v29  ;;  %v2893_v50 = vmax.f32 %v2891_v25, %v2892_v56  ;;  %v3519_v25 = vpop.permute.xlu1 %3518 }
 0x2f5   :  { %v2912_v13 = vsel %vm1025_vm2, %v2706_v48, -inf  ;;  %3625 = vst.msk [vmem:[#allocation2 + $0x10] sm:$0xff] %vm3622_vm12, %v3620_v12  ;;  %v2889_v41 = vrot.slane %v2888_v5, 1  ;;  %v2901_v32 = vrot.slane %v2900_v26, 2  ;;  %v2644_v6 = vrot.slane %v2516_v27, %v4416_v47 }
 0x2f6   :  { %v2913_v46 = vrot.slane %v2912_v13, 4  ;;  %v2905_v44 = vsel %vm1025_vm2, %v2705_v35, -inf  ;;  %v2882_v28 = vrot.slane %v2881_v36, 1  ;;  %v2894_v57 = vrot.slane %v2893_v50, 2  ;;  %v4127_v54 = vpop.f32.mrb[36].mxu1 }
 0x2f7   :  { %v2906_v20 = vrot.slane %v2905_v44, 4  ;;  %v2890_v4 = vmax.f32 %v2888_v5, %v2889_v41  ;;  %v2902_v19 = vmax.f32 %v2900_v26, %v2901_v32  ;;  %v2708_v63 = vadd.f32 %v4127_v54, %v2644_v6  ;;  %v2308_v10 = vpop.f32.mrb[37].mxu1 }
 0x2f8   :  { %v2914_v62 = vmax.f32 %v2912_v13, %v2913_v46  ;;  %v2883_v34 = vmax.f32 %v2881_v36, %v2882_v28  ;;  %v2895_v30 = vmax.f32 %v2893_v50, %v2894_v57  ;;  %v2707_v38 = vadd.f32 %v2640_v42, %v2308_v10  ;;  %v3603_v56 = vpop.permute.xlu1 %3602 }
 0x2f9   :  { %v2907_v0 = vmax.f32 %v2905_v44, %v2906_v20  ;;  %v2903_v24 = vrot.slane %v2902_v19, 1  ;;  %v2926_v39 = vsel %vm1025_vm2, %v2708_v63, -inf }
 0x2fa   :  { %v2915_v52 = vrot.slane %v2914_v62, 2  ;;  %v3441_v61 = vsel %vm3413_vm3, %v2890_v4, %v2883_v34  ;;  %v2896_v2 = vrot.slane %v2895_v30, 1  ;;  %v2927_v7 = vrot.slane %v2926_v39, 4 }
 0x2fb   :  { %v2908_v9 = vrot.slane %v2907_v0, 2  ;;  %v2919_v18 = vsel %vm1025_vm2, %v2707_v38, -inf  ;;  %v2904_v59 = vmax.f32 %v2902_v19, %v2903_v24 }
 0x2fc   :  { %v2916_v40 = vmax.f32 %v2914_v62, %v2915_v52  ;;  %v2897_v8 = vmax.f32 %v2895_v30, %v2896_v2  ;;  %v2920_v58 = vrot.slane %v2919_v18, 4  ;;  %v2928_v23 = vmax.f32 %v2926_v39, %v2927_v7 }
 0x2fd   :  { %v2909_v47 = vmax.f32 %v2907_v0, %v2908_v9 }
 0x2fe   :  { %v2917_v17 = vrot.slane %v2916_v40, 1  ;;  %v3442_v51 = vsel %vm3415_vm4, %v2897_v8, %v3441_v61  ;;  %v2921_v3 = vmax.f32 %v2919_v18, %v2920_v58  ;;  %v2929_v11 = vrot.slane %v2928_v23, 2 }
 0x2ff   :  { %v2910_v49 = vrot.slane %v2909_v47, 1  ;;  %v3443_v43 = vsel %vm3417_vm5, %v2904_v59, %v3442_v51 }
 0x300   :  { %v2922_v14 = vrot.slane %v2921_v3, 2  ;;  %v2918_v45 = vmax.f32 %v2916_v40, %v2917_v17  ;;  %v2930_v53 = vmax.f32 %v2928_v23, %v2929_v11 }
 0x301   :  { %v2911_v15 = vmax.f32 %v2909_v47, %v2910_v49 }
 0x302   :  { %v2923_v33 = vmax.f32 %v2921_v3, %v2922_v14  ;;  %v2931_v22 = vrot.slane %v2930_v53, 1 }
 0x303   :  { %v3444_v27 = vsel %vm3419_vm6, %v2911_v15, %v3443_v43 }
 0x304   :  { %v3445_v55 = vsel %vm3421_vm7, %v2918_v45, %v3444_v27  ;;  %v2924_v21 = vrot.slane %v2923_v33, 1  ;;  %v2932_v31 = vmax.f32 %v2930_v53, %v2931_v22 }
 0x306   :  { %v2925_v37 = vmax.f32 %v2923_v33, %v2924_v21 }
 0x308   :  { %v3446_v29 = vsel %vm3423_vm8, %v2925_v37, %v3445_v55 }
 0x309   :  { %v3447_v48 = vsel %vm3425_vm9, %v2932_v31, %v3446_v29 }
 0x30a   :  { %v3611_v60 = vsel %vm1025_vm2, %v3447_v48, %v3519_v25 }
 0x30b   :  { %v3616_v16 = vsel %vm3612_vm10, %v3611_v60, %v5198_v1 }
 0x30c   :  { %v3621_v5 = vsel %vm3617_vm11, %v3616_v16, %v3603_v56 }
 0x30d   :  { %3626 = vst.msk [vmem:[#allocation2 + $0x18] sm:$0xff] %vm3622_vm12, %v3621_v5 }
 0x30e   :  { %4183 = shalt.err (!%p4180_p4)
}
 0x30f   :  { %s4184_s8 = scalar_lea.hbm %s5254_s5, 512 }
 0x310   :  { %p4185_p5 = scmp.ne.s32.totalorder %s5254_s5, %s4184_s8  ;;  %p4188_p6 = scmp.lt.u32.totalorder %s4184_s8, %s5254_s5 }
 0x312   :  { %p4190_p7 = pnand %p4188_p6, %p4185_p5 }
 0x314   :  { %4193 = shalt.err (!%p4190_p7)
}
 0x315   :  { %s4202_s13 = smov 128  }
 0x316   :  { %3638 = dma.vmem_to_hbm [thread:$0]  %s3633_s29, 512, %s5254_s5, [#allocation3], %s4202_s13, %s4202_s13, %s4200_s25  }
 0x317   :  { %4194 = dma.done.wait [#allocation3], 512  }
 0x318   :  { %4195 = vsyncadd [#allocation3], 4294966784 }
 0x319   :  { %3642 = vsyncpa [#allocation3], 1 }

</bundles_post_ra>
